<compile_context>
chip_gen: v6e
topology: v6e:2x2x1
jax: 0.10.0
libtpu: 0.0.40
codegen_flags: <defaults>
</compile_context>

<pallas_src>
import functools

import jax
import jax.numpy as jnp
from jax.experimental import pallas as pl
from jax.experimental.pallas import tpu as pltpu


_TILE_M = 256  # rows per grid step; multiple of 8 sublanes, VMEM-friendly on v7x


def _row_tiling(m):
    """Pick an M tile (full extent, or a multiple-of-8 tile) and grid size."""
    if m <= _TILE_M:
        return m, 1
    return _TILE_M, pl.cdiv(m, _TILE_M)


# ----------------------------------------------------------------------------- kernels

def _conv_matmul_kernel(x_ref, w_ref, b_ref, o_ref, *, relu):
    """Fused (im2col-patches @ weight) + bias (+ ReLU) for one M-tile."""
    acc = jnp.dot(x_ref[...], w_ref[...], preferred_element_type=jnp.float32)
    acc = acc + b_ref[...]
    if relu:
        acc = jnp.maximum(acc, 0.0)
    o_ref[...] = acc.astype(o_ref.dtype)


def conv_matmul(patches, w_mat, bias, *, relu):
    M, K = patches.shape
    Kw, cout = w_mat.shape
    assert K == Kw
    tm, gm = _row_tiling(M)
    return pl.pallas_call(
        functools.partial(_conv_matmul_kernel, relu=relu),
        out_shape=jax.ShapeDtypeStruct((M, cout), jnp.float32),
        grid=(gm,),
        in_specs=[
            pl.BlockSpec((tm, K), lambda i: (i, 0)),
            pl.BlockSpec((K, cout), lambda i: (0, 0)),   # weights stay resident
            pl.BlockSpec((1, cout), lambda i: (0, 0)),
        ],
        out_specs=pl.BlockSpec((tm, cout), lambda i: (i, 0)),
        compiler_params=pltpu.CompilerParams(dimension_semantics=("parallel",)),
    )(patches, w_mat, bias.reshape(1, cout))


def _outconv_residual_kernel(x_ref, w_ref, b_ref, xt_ref, o_ref, *, dt):
    """Output conv (as matmul) fused with the Euler residual: xt + dt*conv(x)."""
    acc = jnp.dot(x_ref[...], w_ref[...], preferred_element_type=jnp.float32)
    acc = acc + b_ref[...]
    o_ref[...] = (xt_ref[...] + dt * acc).astype(o_ref.dtype)


def outconv_residual(patches, w_mat, bias, xt_flat, dt):
    M, K = patches.shape
    _, cout = w_mat.shape
    tm, gm = _row_tiling(M)
    return pl.pallas_call(
        functools.partial(_outconv_residual_kernel, dt=float(dt)),
        out_shape=jax.ShapeDtypeStruct((M, cout), jnp.float32),
        grid=(gm,),
        in_specs=[
            pl.BlockSpec((tm, K), lambda i: (i, 0)),
            pl.BlockSpec((K, cout), lambda i: (0, 0)),
            pl.BlockSpec((1, cout), lambda i: (0, 0)),
            pl.BlockSpec((tm, cout), lambda i: (i, 0)),
        ],
        out_specs=pl.BlockSpec((tm, cout), lambda i: (i, 0)),
        compiler_params=pltpu.CompilerParams(dimension_semantics=("parallel",)),
    )(patches, w_mat, bias.reshape(1, cout), xt_flat)


def _convlstm_kernel(xp_ref, hp_ref, wx_ref, wh_ref, b_ref, c_ref,
                     h_out, c_out, *, hidden):
    """Fused ConvLSTM cell for one M-tile.

    Two MXU matmuls (x-patches and h-patches) accumulate into a lane-dense
    4*hidden gate block (order i, f, c~, o); gate nonlinearities and the
    cell/hidden state updates are fused in the same kernel.
    """
    gates = jnp.dot(xp_ref[...], wx_ref[...], preferred_element_type=jnp.float32)
    gates = gates + jnp.dot(hp_ref[...], wh_ref[...],
                            preferred_element_type=jnp.float32)
    gates = gates + b_ref[...]
    gi = jax.nn.sigmoid(gates[:, 0 * hidden:1 * hidden])
    gf = jax.nn.sigmoid(gates[:, 1 * hidden:2 * hidden])
    gc = jnp.tanh(gates[:, 2 * hidden:3 * hidden])
    go = jax.nn.sigmoid(gates[:, 3 * hidden:4 * hidden])
    cc = gf * c_ref[...] + gi * gc
    h_out[...] = (go * jnp.tanh(cc)).astype(h_out.dtype)
    c_out[...] = cc.astype(c_out.dtype)


def convlstm_cell(x_patches, h_patches, wx_comb, wh_comb, b_comb, c_flat, hidden):
    M, Kx = x_patches.shape
    _, Kh = h_patches.shape
    tm, gm = _row_tiling(M)
    h_new, c_new = pl.pallas_call(
        functools.partial(_convlstm_kernel, hidden=hidden),
        out_shape=(jax.ShapeDtypeStruct((M, hidden), jnp.float32),
                   jax.ShapeDtypeStruct((M, hidden), jnp.float32)),
        grid=(gm,),
        in_specs=[
            pl.BlockSpec((tm, Kx), lambda i: (i, 0)),
            pl.BlockSpec((tm, Kh), lambda i: (i, 0)),
            pl.BlockSpec((Kx, 4 * hidden), lambda i: (0, 0)),   # resident weights
            pl.BlockSpec((Kh, 4 * hidden), lambda i: (0, 0)),
            pl.BlockSpec((1, 4 * hidden), lambda i: (0, 0)),
            pl.BlockSpec((tm, hidden), lambda i: (i, 0)),
        ],
        out_specs=(pl.BlockSpec((tm, hidden), lambda i: (i, 0)),
                   pl.BlockSpec((tm, hidden), lambda i: (i, 0))),
        input_output_aliases={5: 1},   # update cell state in place
        compiler_params=pltpu.CompilerParams(dimension_semantics=("parallel",)),
    )(x_patches, h_patches, wx_comb, wh_comb, b_comb, c_flat)
    return h_new, c_new


# ----------------------------------------------------------------------------- JAX glue

def circular_im2col(x_nhwc, k, stride, pad):
    """Circular ('wrap') padding + patch extraction (kh, kw, cin ordering)."""
    N, H, W, cin = x_nhwc.shape
    xp = jnp.pad(x_nhwc, ((0, 0), (pad, pad), (pad, pad), (0, 0)), mode="wrap")
    Hp, Wp = H + 2 * pad, W + 2 * pad
    OH = (Hp - k) // stride + 1
    OW = (Wp - k) // stride + 1
    cols = []
    for kh in range(k):
        for kw in range(k):
            sl = jax.lax.slice(
                xp,
                (0, kh, kw, 0),
                (N, kh + stride * (OH - 1) + 1, kw + stride * (OW - 1) + 1, cin),
                (1, stride, stride, 1),
            )  # (N, OH, OW, cin)
            cols.append(sl)
    patches = jnp.concatenate(cols, axis=-1)          # (N, OH, OW, k*k*cin)
    return patches.reshape(N * OH * OW, k * k * cin), (N, OH, OW)


def torch_conv_weight_to_mat(w_oikk):
    """(Cout, Cin, KH, KW) torch weight -> (KH*KW*Cin, Cout) matmul weight."""
    cout = w_oikk.shape[0]
    return jnp.transpose(w_oikk, (2, 3, 1, 0)).reshape(-1, cout)


def pixel_shuffle_nhwc(x_nhwc, r):
    """Matches torch.nn.PixelShuffle semantics (channel index = c*r*r + i*r + j)."""
    N, H, W, C = x_nhwc.shape
    cout = C // (r * r)
    x = x_nhwc.reshape(N, H, W, cout, r, r)
    x = jnp.transpose(x, (0, 1, 4, 2, 5, 3))          # N, H, r, W, r, cout
    return x.reshape(N, H * r, W * r, cout)


# ----------------------------------------------------------------------------- model

class PhyCRNetPallas:
    """Forward-pass-only re-implementation of PhyCRNet with Pallas TPU kernels."""

    def __init__(self, input_channels, hidden_channels, input_kernel_size,
                 input_stride, input_padding, dt, num_layers, upscale_factor,
                 step=1, effective_step=(1,), key=None):
        self.input_channels = [input_channels] + list(hidden_channels)
        self.hidden_channels = list(hidden_channels)
        self.input_kernel_size = list(input_kernel_size)
        self.input_stride = list(input_stride)
        self.input_padding = list(input_padding)
        self.step = step
        self.effective_step = list(effective_step)
        self.dt = dt
        self.upscale_factor = upscale_factor
        self.num_encoder = num_layers[0]
        self.num_convlstm = num_layers[1]

        if key is None:
            key = jax.random.PRNGKey(0)
        bound = float((1.0 / (3 * 3 * 320)) ** 0.5)   # initialize_weights() range

        def conv_w(k_, cout, cin, ksz):
            return jax.random.uniform(k_, (cout, cin, ksz, ksz), jnp.float32,
                                      -bound, bound)

        # ---- encoders (weight-normed conv + ReLU, bias zeroed) -------------
        # Weight-norm reparameterization + layout transform are done ONCE here
        # (hoisted off the per-step path).
        self.encoders = []
        for i in range(self.num_encoder):
            key, kv = jax.random.split(key)
            cin, cout = self.input_channels[i], self.hidden_channels[i]
            ksz = self.input_kernel_size[i]
            v = conv_w(kv, cout, cin, ksz)
            norm = jnp.sqrt(jnp.sum(v * v, axis=(1, 2, 3), keepdims=True))
            g = norm                                   # weight_norm init: g = ||v||
            w_eff = g * v / norm
            self.encoders.append(dict(
                w_mat=torch_conv_weight_to_mat(w_eff),
                b=jnp.zeros((cout,), jnp.float32),
                k=ksz, stride=self.input_stride[i], pad=self.input_padding[i]))

        # ---- ConvLSTM cells (gate order i, f, c~, o) ------------------------
        # Wx biases: [0,0,0,1]; Wh has no bias.  The 8 gate convs are folded
        # into TWO matmul weights (x-path and h-path) and ONE (1, 4*hidden)
        # bias so the kernel never needs a concatenated patch buffer.
        self.convlstms = []
        for i in range(self.num_encoder, self.num_encoder + self.num_convlstm):
            cin, ch = self.input_channels[i], self.hidden_channels[i]
            ksz = self.input_kernel_size[i]
            gate_wx, gate_wh = [], []
            for _ in range(4):
                key, ka, kb = jax.random.split(key, 3)
                gate_wx.append(torch_conv_weight_to_mat(conv_w(ka, ch, cin, ksz)))  # (Kx, ch)
                gate_wh.append(torch_conv_weight_to_mat(conv_w(kb, ch, ch, 3)))     # (Kh, ch)
            wx_comb = jnp.concatenate(gate_wx, axis=1)                      # (Kx, 4*ch)
            wh_comb = jnp.concatenate(gate_wh, axis=1)                      # (Kh, 4*ch)
            b_comb = jnp.concatenate(
                [jnp.zeros((1, 3 * ch), jnp.float32),
                 jnp.ones((1, ch), jnp.float32)], axis=1)                   # Wxo.bias = 1
            self.convlstms.append(dict(
                wx=wx_comb, wh=wh_comb, b=b_comb,
                k=ksz, stride=self.input_stride[i], pad=self.input_padding[i],
                hidden=ch))

        # ---- output layer: Conv2d(2, 2, k=5, stride=1, pad=2, circular) ----
        key, ko = jax.random.split(key)
        self.out_w = torch_conv_weight_to_mat(conv_w(ko, 2, 2, 5))
        self.out_b = jnp.zeros((2,), jnp.float32)

    # --- layer applications (NHWC) ---
    def _apply_encoder(self, enc, x):
        patches, (N, OH, OW) = circular_im2col(x, enc["k"], enc["stride"], enc["pad"])
        out = conv_matmul(patches, enc["w_mat"], enc["b"], relu=True)
        return out.reshape(N, OH, OW, -1)

    def _apply_convlstm(self, cell, x, h, c):
        xp, (N, OH, OW) = circular_im2col(x, cell["k"], cell["stride"], cell["pad"])
        hp, _ = circular_im2col(h, 3, 1, 1)
        c_flat = c.reshape(N * OH * OW, cell["hidden"])
        h_new, c_new = convlstm_cell(xp, hp, cell["wx"], cell["wh"], cell["b"],
                                     c_flat, cell["hidden"])
        shp = (N, OH, OW, cell["hidden"])
        return h_new.reshape(shp), c_new.reshape(shp)

    def _apply_output_residual(self, x, xt):
        patches, (N, OH, OW) = circular_im2col(x, 5, 1, 2)
        xt_flat = xt.reshape(N * OH * OW, xt.shape[-1])
        out = outconv_residual(patches, self.out_w, self.out_b, xt_flat, self.dt)
        return out.reshape(N, OH, OW, -1)

    # --- forward pass (public interface is NCHW like the PyTorch reference) ---
    def forward(self, initial_state, x_nchw):
        internal_state = []
        outputs = []
        second_last_state = []

        x = jnp.transpose(x_nchw, (0, 2, 3, 1))      # NCHW -> NHWC

        for step in range(self.step):
            xt = x
            for enc in self.encoders:
                x = self._apply_encoder(enc, x)
            for li, cell in enumerate(self.convlstms):
                if step == 0:
                    h0, c0 = initial_state[li]
                    h = jnp.transpose(h0, (0, 2, 3, 1))
                    c = jnp.transpose(c0, (0, 2, 3, 1))
                    internal_state.append((h, c))
                h, c = internal_state[li]
                x, new_c = self._apply_convlstm(cell, x, h, c)
                internal_state[li] = (x, new_c)

            x = pixel_shuffle_nhwc(x, self.upscale_factor)
            x = self._apply_output_residual(x, xt)   # x = xt + dt * f(x), fused

            if step == self.step - 2:
                second_last_state = list(internal_state)
            if step in self.effective_step:
                outputs.append(jnp.transpose(x, (0, 3, 1, 2)))   # back to NCHW

        second_last_state = [
            (jnp.transpose(h, (0, 3, 1, 2)), jnp.transpose(c, (0, 3, 1, 2)))
            for (h, c) in second_last_state
        ]
        return outputs, second_last_state


# ----------------------------------------------------------------------------- main

if __name__ == "__main__":
    key = jax.random.PRNGKey(0)
    k_model, k_x, k_h, k_c = jax.random.split(key, 4)

    # Small Burgers-style config: 2 encoders (stride 2 each) + 1 ConvLSTM,
    # pixel-shuffle upscale 4 restores full resolution, 2-channel (u, v) field.
    N, C, H, W = 2, 2, 32, 32
    hidden_channels = [8, 16, 32]
    model = PhyCRNetPallas(
        input_channels=2,
        hidden_channels=hidden_channels,
        input_kernel_size=[4, 4, 3],
        input_stride=[2, 2, 1],
        input_padding=[1, 1, 1],
        dt=0.002,
        num_layers=[2, 1],
        upscale_factor=4,
        step=2,
        effective_step=[0, 1],
        key=k_model,
    )

    x = jax.random.normal(k_x, (N, C, H, W), jnp.float32)
    # ConvLSTM hidden/cell initial state at the latent resolution (H/4, W/4), 32 channels
    h0 = jax.random.normal(k_h, (N, 32, H // 4, W // 4), jnp.float32)
    c0 = jax.random.normal(k_c, (N, 32, H // 4, W // 4), jnp.float32)
    initial_state = [(h0, c0)]

    forward_jit = jax.jit(model.forward)             # fuse the JAX glue between kernels
    outputs, second_last_state = forward_jit(initial_state, x)
    jax.block_until_ready((outputs, second_last_state))

    assert len(outputs) == 2 and outputs[0].shape == (N, C, H, W)
    assert len(second_last_state) == 1
    assert second_last_state[0][0].shape == (N, 32, H // 4, W // 4)
    assert all(bool(jnp.all(jnp.isfinite(o))) for o in outputs)
    print("KERNEL_OK")
</pallas_src>

<mosaic_0001>
module attributes {stable_mosaic.version = 11 : i64} {
  func.func @_conv_matmul_kernel(%arg0: i32, %arg1: memref<256x32xf32, #tpu.memory_space<vmem>>, %arg2: memref<32x8xf32, #tpu.memory_space<vmem>>, %arg3: memref<1x8xf32, #tpu.memory_space<vmem>>, %arg4: memref<256x8xf32, #tpu.memory_space<vmem>>) attributes {dimension_semantics = [#tpu.dimension_semantics<parallel>], iteration_bounds = array<i64: 2>, scalar_prefetch = 0 : i64, scratch_operands = 0 : i64, tpu.core_type = #tpu.core_type<tc>, window_params = [{transform_indices = @transform_0, window_bounds = array<i64: 256, 32>}, {pipeline_mode = #tpu.pipeline_mode<synchronous>, transform_indices = @transform_1, window_bounds = array<i64: 32, 8>}, {pipeline_mode = #tpu.pipeline_mode<synchronous>, transform_indices = @transform_2, window_bounds = array<i64: 1, 8>}, {transform_indices = @transform_3, window_bounds = array<i64: 256, 8>}]} {
    %c0 = arith.constant 0 : index
    %c0_0 = arith.constant 0 : index
    %0 = vector.load %arg1[%c0, %c0_0] : memref<256x32xf32, #tpu.memory_space<vmem>>, vector<256x32xf32>
    %c0_1 = arith.constant 0 : index
    %c0_2 = arith.constant 0 : index
    %1 = vector.load %arg2[%c0_1, %c0_2] : memref<32x8xf32, #tpu.memory_space<vmem>>, vector<32x8xf32>
    %cst = arith.constant dense<0.000000e+00> : vector<256x8xf32>
    %2 = tpu.matmul %0, %1, %cst {dimension_numbers = #tpu.dot_dimension_numbers<[1], [0], [0], [1], [0, 0, 1, 1], [], []>} : vector<256x32xf32>, vector<32x8xf32>, vector<256x8xf32> -> vector<256x8xf32>
    %c0_3 = arith.constant 0 : index
    %c0_4 = arith.constant 0 : index
    %3 = vector.load %arg3[%c0_3, %c0_4] : memref<1x8xf32, #tpu.memory_space<vmem>>, vector<1x8xf32>
    %4 = vector.broadcast %3 : vector<1x8xf32> to vector<256x8xf32>
    %5 = arith.addf %2, %4 : vector<256x8xf32>
    %cst_5 = arith.constant 0.000000e+00 : f32
    %6 = vector.broadcast %cst_5 : f32 to vector<256x8xf32>
    %7 = arith.maximumf %5, %6 : vector<256x8xf32>
    %c0_6 = arith.constant 0 : index
    %c0_7 = arith.constant 0 : index
    %8 = vector.load %arg4[%c0_6, %c0_7] : memref<256x8xf32, #tpu.memory_space<vmem>>, vector<256x8xf32>
    tpu.vector_store %arg4[%c0_6, %c0_7], %7 {strides = array<i32>} : memref<256x8xf32, #tpu.memory_space<vmem>>, vector<256x8xf32>,
    return
  }
  func.func @transform_0(%arg0: i32) -> (i32, i32) {
    %c0_i32 = arith.constant 0 : i32
    %c0_i32_0 = arith.constant 0 : i32
    return %arg0, %c0_i32 : i32, i32
  }
  func.func @transform_1(%arg0: i32) -> (i32, i32) {
    %c0_i32 = arith.constant 0 : i32
    %c0_i32_0 = arith.constant 0 : i32
    %c0_i32_1 = arith.constant 0 : i32
    return %c0_i32, %c0_i32_0 : i32, i32
  }
  func.func @transform_2(%arg0: i32) -> (i32, i32) {
    %c0_i32 = arith.constant 0 : i32
    %c0_i32_0 = arith.constant 0 : i32
    %c0_i32_1 = arith.constant 0 : i32
    return %c0_i32, %c0_i32_0 : i32, i32
  }
  func.func @transform_3(%arg0: i32) -> (i32, i32) {
    %c0_i32 = arith.constant 0 : i32
    %c0_i32_0 = arith.constant 0 : i32
    return %arg0, %c0_i32 : i32, i32
  }
}

module attributes {stable_mosaic.version = 11 : i64} {
  func.func @_conv_matmul_kernel(%arg0: i32, %arg1: memref<128x128xf32, #tpu.memory_space<vmem>>, %arg2: memref<128x16xf32, #tpu.memory_space<vmem>>, %arg3: memref<1x16xf32, #tpu.memory_space<vmem>>, %arg4: memref<128x16xf32, #tpu.memory_space<vmem>>) attributes {dimension_semantics = [#tpu.dimension_semantics<parallel>], iteration_bounds = array<i64: 1>, scalar_prefetch = 0 : i64, scratch_operands = 0 : i64, tpu.core_type = #tpu.core_type<tc>, window_params = [{transform_indices = @transform_0, window_bounds = array<i64: 128, 128>}, {pipeline_mode = #tpu.pipeline_mode<synchronous>, transform_indices = @transform_1, window_bounds = array<i64: 128, 16>}, {pipeline_mode = #tpu.pipeline_mode<synchronous>, transform_indices = @transform_2, window_bounds = array<i64: 1, 16>}, {transform_indices = @transform_3, window_bounds = array<i64: 128, 16>}]} {
    %c0 = arith.constant 0 : index
    %c0_0 = arith.constant 0 : index
    %0 = vector.load %arg1[%c0, %c0_0] : memref<128x128xf32, #tpu.memory_space<vmem>>, vector<128x128xf32>
    %c0_1 = arith.constant 0 : index
    %c0_2 = arith.constant 0 : index
    %1 = vector.load %arg2[%c0_1, %c0_2] : memref<128x16xf32, #tpu.memory_space<vmem>>, vector<128x16xf32>
    %cst = arith.constant dense<0.000000e+00> : vector<128x16xf32>
    %2 = tpu.matmul %0, %1, %cst {dimension_numbers = #tpu.dot_dimension_numbers<[1], [0], [0], [1], [0, 0, 1, 1], [], []>} : vector<128x128xf32>, vector<128x16xf32>, vector<128x16xf32> -> vector<128x16xf32>
    %c0_3 = arith.constant 0 : index
    %c0_4 = arith.constant 0 : index
    %3 = vector.load %arg3[%c0_3, %c0_4] : memref<1x16xf32, #tpu.memory_space<vmem>>, vector<1x16xf32>
    %4 = vector.broadcast %3 : vector<1x16xf32> to vector<128x16xf32>
    %5 = arith.addf %2, %4 : vector<128x16xf32>
    %cst_5 = arith.constant 0.000000e+00 : f32
    %6 = vector.broadcast %cst_5 : f32 to vector<128x16xf32>
    %7 = arith.maximumf %5, %6 : vector<128x16xf32>
    %c0_6 = arith.constant 0 : index
    %c0_7 = arith.constant 0 : index
    %8 = vector.load %arg4[%c0_6, %c0_7] : memref<128x16xf32, #tpu.memory_space<vmem>>, vector<128x16xf32>
    tpu.vector_store %arg4[%c0_6, %c0_7], %7 {strides = array<i32>} : memref<128x16xf32, #tpu.memory_space<vmem>>, vector<128x16xf32>,
    return
  }
  func.func @transform_0(%arg0: i32) -> (i32, i32) {
    %c0_i32 = arith.constant 0 : i32
    %c0_i32_0 = arith.constant 0 : i32
    return %arg0, %c0_i32 : i32, i32
  }
  func.func @transform_1(%arg0: i32) -> (i32, i32) {
    %c0_i32 = arith.constant 0 : i32
    %c0_i32_0 = arith.constant 0 : i32
    %c0_i32_1 = arith.constant 0 : i32
    return %c0_i32, %c0_i32_0 : i32, i32
  }
  func.func @transform_2(%arg0: i32) -> (i32, i32) {
    %c0_i32 = arith.constant 0 : i32
    %c0_i32_0 = arith.constant 0 : i32
    %c0_i32_1 = arith.constant 0 : i32
    return %c0_i32, %c0_i32_0 : i32, i32
  }
  func.func @transform_3(%arg0: i32) -> (i32, i32) {
    %c0_i32 = arith.constant 0 : i32
    %c0_i32_0 = arith.constant 0 : i32
    return %arg0, %c0_i32 : i32, i32
  }
}

module attributes {stable_mosaic.version = 11 : i64} {
  func.func @_convlstm_kernel(%arg0: i32, %arg1: memref<128x144xf32, #tpu.memory_space<vmem>>, %arg2: memref<128x288xf32, #tpu.memory_space<vmem>>, %arg3: memref<144x128xf32, #tpu.memory_space<vmem>>, %arg4: memref<288x128xf32, #tpu.memory_space<vmem>>, %arg5: memref<1x128xf32, #tpu.memory_space<vmem>>, %arg6: memref<128x32xf32, #tpu.memory_space<vmem>>, %arg7: memref<128x32xf32, #tpu.memory_space<vmem>>, %arg8: memref<128x32xf32, #tpu.memory_space<vmem>>) attributes {dimension_semantics = [#tpu.dimension_semantics<parallel>], iteration_bounds = array<i64: 1>, scalar_prefetch = 0 : i64, scratch_operands = 0 : i64, tpu.core_type = #tpu.core_type<tc>, window_params = [{transform_indices = @transform_0, window_bounds = array<i64: 128, 144>}, {transform_indices = @transform_1, window_bounds = array<i64: 128, 288>}, {pipeline_mode = #tpu.pipeline_mode<synchronous>, transform_indices = @transform_2, window_bounds = array<i64: 144, 128>}, {pipeline_mode = #tpu.pipeline_mode<synchronous>, transform_indices = @transform_3, window_bounds = array<i64: 288, 128>}, {pipeline_mode = #tpu.pipeline_mode<synchronous>, transform_indices = @transform_4, window_bounds = array<i64: 1, 128>}, {transform_indices = @transform_5, window_bounds = array<i64: 128, 32>}, {transform_indices = @transform_6, window_bounds = array<i64: 128, 32>}, {transform_indices = @transform_7, window_bounds = array<i64: 128, 32>}]} {
    %c0 = arith.constant 0 : index
    %c0_0 = arith.constant 0 : index
    %0 = vector.load %arg1[%c0, %c0_0] : memref<128x144xf32, #tpu.memory_space<vmem>>, vector<128x144xf32>
    %c0_1 = arith.constant 0 : index
    %c0_2 = arith.constant 0 : index
    %1 = vector.load %arg3[%c0_1, %c0_2] : memref<144x128xf32, #tpu.memory_space<vmem>>, vector<144x128xf32>
    %cst = arith.constant dense<0.000000e+00> : vector<128x128xf32>
    %2 = tpu.matmul %0, %1, %cst {dimension_numbers = #tpu.dot_dimension_numbers<[1], [0], [0], [1], [0, 0, 1, 1], [], []>} : vector<128x144xf32>, vector<144x128xf32>, vector<128x128xf32> -> vector<128x128xf32>
    %c0_3 = arith.constant 0 : index
    %c0_4 = arith.constant 0 : index
    %3 = vector.load %arg2[%c0_3, %c0_4] : memref<128x288xf32, #tpu.memory_space<vmem>>, vector<128x288xf32>
    %c0_5 = arith.constant 0 : index
    %c0_6 = arith.constant 0 : index
    %4 = vector.load %arg4[%c0_5, %c0_6] : memref<288x128xf32, #tpu.memory_space<vmem>>, vector<288x128xf32>
    %cst_7 = arith.constant dense<0.000000e+00> : vector<128x128xf32>
    %5 = tpu.matmul %3, %4, %cst_7 {dimension_numbers = #tpu.dot_dimension_numbers<[1], [0], [0], [1], [0, 0, 1, 1], [], []>} : vector<128x288xf32>, vector<288x128xf32>, vector<128x128xf32> -> vector<128x128xf32>
    %6 = arith.addf %2, %5 : vector<128x128xf32>
    %c0_8 = arith.constant 0 : index
    %c0_9 = arith.constant 0 : index
    %7 = vector.load %arg5[%c0_8, %c0_9] : memref<1x128xf32, #tpu.memory_space<vmem>>, vector<1x128xf32>
    %8 = vector.broadcast %7 : vector<1x128xf32> to vector<128x128xf32>
    %9 = arith.addf %6, %8 : vector<128x128xf32>
    %10 = vector.extract_strided_slice %9 {offsets = [0, 0], sizes = [128, 32], strides = [1, 1]} : vector<128x128xf32> to vector<128x32xf32>
    %11 = arith.negf %10 : vector<128x32xf32>
    %12 = math.exp %11 : vector<128x32xf32>
    %cst_10 = arith.constant 1.000000e+00 : f32
    %13 = vector.broadcast %cst_10 : f32 to vector<128x32xf32>
    %14 = arith.addf %13, %12 : vector<128x32xf32>
    %15 = arith.divf %13, %14 : vector<128x32xf32>
    %16 = vector.extract_strided_slice %9 {offsets = [0, 32], sizes = [128, 32], strides = [1, 1]} : vector<128x128xf32> to vector<128x32xf32>
    %17 = arith.negf %16 : vector<128x32xf32>
    %18 = math.exp %17 : vector<128x32xf32>
    %cst_11 = arith.constant 1.000000e+00 : f32
    %19 = vector.broadcast %cst_11 : f32 to vector<128x32xf32>
    %20 = arith.addf %19, %18 : vector<128x32xf32>
    %21 = arith.divf %19, %20 : vector<128x32xf32>
    %22 = vector.extract_strided_slice %9 {offsets = [0, 64], sizes = [128, 32], strides = [1, 1]} : vector<128x128xf32> to vector<128x32xf32>
    %23 = math.tanh %22 : vector<128x32xf32>
    %24 = vector.extract_strided_slice %9 {offsets = [0, 96], sizes = [128, 32], strides = [1, 1]} : vector<128x128xf32> to vector<128x32xf32>
    %25 = arith.negf %24 : vector<128x32xf32>
    %26 = math.exp %25 : vector<128x32xf32>
    %cst_12 = arith.constant 1.000000e+00 : f32
    %27 = vector.broadcast %cst_12 : f32 to vector<128x32xf32>
    %28 = arith.addf %27, %26 : vector<128x32xf32>
    %29 = arith.divf %27, %28 : vector<128x32xf32>
    %c0_13 = arith.constant 0 : index
    %c0_14 = arith.constant 0 : index
    %30 = vector.load %arg6[%c0_13, %c0_14] : memref<128x32xf32, #tpu.memory_space<vmem>>, vector<128x32xf32>
    %31 = arith.mulf %21, %30 : vector<128x32xf32>
    %32 = arith.mulf %15, %23 : vector<128x32xf32>
    %33 = arith.addf %31, %32 : vector<128x32xf32>
    %34 = math.tanh %33 : vector<128x32xf32>
    %35 = arith.mulf %29, %34 : vector<128x32xf32>
    %c0_15 = arith.constant 0 : index
    %c0_16 = arith.constant 0 : index
    %36 = vector.load %arg7[%c0_15, %c0_16] : memref<128x32xf32, #tpu.memory_space<vmem>>, vector<128x32xf32>
    tpu.vector_store %arg7[%c0_15, %c0_16], %35 {strides = array<i32>} : memref<128x32xf32, #tpu.memory_space<vmem>>, vector<128x32xf32>,
    %c0_17 = arith.constant 0 : index
    %c0_18 = arith.constant 0 : index
    %37 = vector.load %arg8[%c0_17, %c0_18] : memref<128x32xf32, #tpu.memory_space<vmem>>, vector<128x32xf32>
    tpu.vector_store %arg8[%c0_17, %c0_18], %33 {strides = array<i32>} : memref<128x32xf32, #tpu.memory_space<vmem>>, vector<128x32xf32>,
    return
  }
  func.func @transform_0(%arg0: i32) -> (i32, i32) {
    %c0_i32 = arith.constant 0 : i32
    %c0_i32_0 = arith.constant 0 : i32
    return %arg0, %c0_i32 : i32, i32
  }
  func.func @transform_1(%arg0: i32) -> (i32, i32) {
    %c0_i32 = arith.constant 0 : i32
    %c0_i32_0 = arith.constant 0 : i32
    return %arg0, %c0_i32 : i32, i32
  }
  func.func @transform_2(%arg0: i32) -> (i32, i32) {
    %c0_i32 = arith.constant 0 : i32
    %c0_i32_0 = arith.constant 0 : i32
    %c0_i32_1 = arith.constant 0 : i32
    return %c0_i32, %c0_i32_0 : i32, i32
  }
  func.func @transform_3(%arg0: i32) -> (i32, i32) {
    %c0_i32 = arith.constant 0 : i32
    %c0_i32_0 = arith.constant 0 : i32
    %c0_i32_1 = arith.constant 0 : i32
    return %c0_i32, %c0_i32_0 : i32, i32
  }
  func.func @transform_4(%arg0: i32) -> (i32, i32) {
    %c0_i32 = arith.constant 0 : i32
    %c0_i32_0 = arith.constant 0 : i32
    %c0_i32_1 = arith.constant 0 : i32
    return %c0_i32, %c0_i32_0 : i32, i32
  }
  func.func @transform_5(%arg0: i32) -> (i32, i32) {
    %c0_i32 = arith.constant 0 : i32
    %c0_i32_0 = arith.constant 0 : i32
    return %arg0, %c0_i32 : i32, i32
  }
  func.func @transform_6(%arg0: i32) -> (i32, i32) {
    %c0_i32 = arith.constant 0 : i32
    %c0_i32_0 = arith.constant 0 : i32
    return %arg0, %c0_i32 : i32, i32
  }
  func.func @transform_7(%arg0: i32) -> (i32, i32) {
    %c0_i32 = arith.constant 0 : i32
    %c0_i32_0 = arith.constant 0 : i32
    return %arg0, %c0_i32 : i32, i32
  }
}

module attributes {stable_mosaic.version = 11 : i64} {
  func.func @_outconv_residual_kernel(%arg0: i32, %arg1: memref<256x50xf32, #tpu.memory_space<vmem>>, %arg2: memref<50x2xf32, #tpu.memory_space<vmem>>, %arg3: memref<1x2xf32, #tpu.memory_space<vmem>>, %arg4: memref<256x2xf32, #tpu.memory_space<vmem>>, %arg5: memref<256x2xf32, #tpu.memory_space<vmem>>) attributes {dimension_semantics = [#tpu.dimension_semantics<parallel>], iteration_bounds = array<i64: 8>, scalar_prefetch = 0 : i64, scratch_operands = 0 : i64, tpu.core_type = #tpu.core_type<tc>, window_params = [{transform_indices = @transform_0, window_bounds = array<i64: 256, 50>}, {pipeline_mode = #tpu.pipeline_mode<synchronous>, transform_indices = @transform_1, window_bounds = array<i64: 50, 2>}, {pipeline_mode = #tpu.pipeline_mode<synchronous>, transform_indices = @transform_2, window_bounds = array<i64: 1, 2>}, {transform_indices = @transform_3, window_bounds = array<i64: 256, 2>}, {transform_indices = @transform_4, window_bounds = array<i64: 256, 2>}]} {
    %c0 = arith.constant 0 : index
    %c0_0 = arith.constant 0 : index
    %0 = vector.load %arg1[%c0, %c0_0] : memref<256x50xf32, #tpu.memory_space<vmem>>, vector<256x50xf32>
    %c0_1 = arith.constant 0 : index
    %c0_2 = arith.constant 0 : index
    %1 = vector.load %arg2[%c0_1, %c0_2] : memref<50x2xf32, #tpu.memory_space<vmem>>, vector<50x2xf32>
    %cst = arith.constant dense<0.000000e+00> : vector<256x2xf32>
    %2 = tpu.matmul %0, %1, %cst {dimension_numbers = #tpu.dot_dimension_numbers<[1], [0], [0], [1], [0, 0, 1, 1], [], []>} : vector<256x50xf32>, vector<50x2xf32>, vector<256x2xf32> -> vector<256x2xf32>
    %c0_3 = arith.constant 0 : index
    %c0_4 = arith.constant 0 : index
    %3 = vector.load %arg3[%c0_3, %c0_4] : memref<1x2xf32, #tpu.memory_space<vmem>>, vector<1x2xf32>
    %4 = vector.broadcast %3 : vector<1x2xf32> to vector<256x2xf32>
    %5 = arith.addf %2, %4 : vector<256x2xf32>
    %c0_5 = arith.constant 0 : index
    %c0_6 = arith.constant 0 : index
    %6 = vector.load %arg4[%c0_5, %c0_6] : memref<256x2xf32, #tpu.memory_space<vmem>>, vector<256x2xf32>
    %cst_7 = arith.constant 2.000000e-03 : f32
    %7 = vector.broadcast %cst_7 : f32 to vector<256x2xf32>
    %8 = arith.mulf %7, %5 : vector<256x2xf32>
    %9 = arith.addf %6, %8 : vector<256x2xf32>
    %c0_8 = arith.constant 0 : index
    %c0_9 = arith.constant 0 : index
    %10 = vector.load %arg5[%c0_8, %c0_9] : memref<256x2xf32, #tpu.memory_space<vmem>>, vector<256x2xf32>
    tpu.vector_store %arg5[%c0_8, %c0_9], %9 {strides = array<i32>} : memref<256x2xf32, #tpu.memory_space<vmem>>, vector<256x2xf32>,
    return
  }
  func.func @transform_0(%arg0: i32) -> (i32, i32) {
    %c0_i32 = arith.constant 0 : i32
    %c0_i32_0 = arith.constant 0 : i32
    return %arg0, %c0_i32 : i32, i32
  }
  func.func @transform_1(%arg0: i32) -> (i32, i32) {
    %c0_i32 = arith.constant 0 : i32
    %c0_i32_0 = arith.constant 0 : i32
    %c0_i32_1 = arith.constant 0 : i32
    return %c0_i32, %c0_i32_0 : i32, i32
  }
  func.func @transform_2(%arg0: i32) -> (i32, i32) {
    %c0_i32 = arith.constant 0 : i32
    %c0_i32_0 = arith.constant 0 : i32
    %c0_i32_1 = arith.constant 0 : i32
    return %c0_i32, %c0_i32_0 : i32, i32
  }
  func.func @transform_3(%arg0: i32) -> (i32, i32) {
    %c0_i32 = arith.constant 0 : i32
    %c0_i32_0 = arith.constant 0 : i32
    return %arg0, %c0_i32 : i32, i32
  }
  func.func @transform_4(%arg0: i32) -> (i32, i32) {
    %c0_i32 = arith.constant 0 : i32
    %c0_i32_0 = arith.constant 0 : i32
    return %arg0, %c0_i32 : i32, i32
  }
}

</mosaic_0001>

<bundles_post_ra>
// kernel: forward.8
= control target key start
LH: loop header
LB: loop body
LE: loop exit
PB: predicated region body
PF: predicated region fallthrough
CT: control target
= control target key end

     0   :  { %s840_s12 = smov 0   ;;  %s1045_s0 = inlined_call_operand.vmem [shape: f32[512,32], index: 0, kind: input, shape index: {}]   ;;  %s1046_s1 = inlined_call_operand.vmem [shape: f32[32,8], index: 1, kind: input, shape index: {}]   ;;  %s1047_s2 = inlined_call_operand.vmem [shape: f32[1,8], index: 2, kind: input, shape index: {}]   ;;  %s1048_s3 = inlined_call_operand.vmem [shape: f32[512,8], index: 3, kind: output, shape index: {}]  }
   0x1 LB: > { %s660_s13 = sadd.s32 4294967295, %s818_s12   ;;  %p664_p0 = scmp.ge.s32.totalorder %s818_s12, 1  ;;  %s818_s12 = sphi %s840_s12, %s13_s12  }
   0x2   : > { %p138_p1 = scmp.lt.s32.totalorder %s818_s12, 3 }
   0x4   : > { %p139_p2 = pnand %p664_p0, %p138_p1 }
   0x5   : > { %s665_s18 = sshll.u32 (!%p139_p2), %s660_s13, 5 }
   0x6   : > { %142 = sbr.rel (%p139_p2) target bundleno = 249 (0xf9), region = 32  ;;  %p163_p3 = scmp.lt.s32.totalorder (!%p139_p2), %s665_s18, 63 }
   0xb   : > { %v209_v0 = vld [vmem:[%s1046_s1 + $0x18] sm:$0xff]  ;;  %v208_v1 = vld [vmem:[%s1046_s1 + $0x10] sm:$0xff]  ;;  %v207_v2 = vld [vmem:[%s1046_s1 + $0x8] sm:$0xff]  ;;  %s1050_s18 = smov (!%p163_p3, %s665_s18), 63  ;;  %vm217_vm0 = vcmask 261120   ;;  %vm571_vm1 = vcmask 64512  }
   0xc   : > { %740 = vmatprep.subr.mxu0 %v209_v0  ;;  %796 = vmatprep.subr.mxu1 %v209_v0  ;;  %v206_v3 = vld [vmem:[%s1046_s1] sm:$0xff]  ;;  %s666_s23 = sshll.u32 %s1050_s18, 3 }
   0xd   : > { %741 = vmatpush3.msra.mxu0 %v209_v0  ;;  %800 = vmatpush3.msra.mxu1 %v209_v0  ;;  %s868_s26 = scalar_lea.vmem %s1045_s0, %s666_s23  ;;  %v937_v36 = vld [vmem:[%s1047_s2] ss:$0 sm:$0xff]  ;;  %s946_s4 = scalar_lea.vmem %s1048_s3, %s666_s23 }
   0xe   : > { %742 = vmatprep.subr.mxu0 %v208_v1  ;;  %797 = vmatprep.subr.mxu1 %v208_v1  ;;  %v174_v4 = vld [vmem:[%s868_s26] sm:$0xff]  ;;  %v175_v6 = vld [vmem:[%s868_s26 + $0x8] sm:$0xff]  ;;  %v176_v8 = vld [vmem:[%s868_s26 + $0x10] sm:$0xff] }
   0xf   : > { %743 = vmatpush3.msra.mxu0 %v208_v1  ;;  %801 = vmatpush3.msra.mxu1 %v208_v1  ;;  %v190_v5 = vld [vmem:[%s868_s26 + $0x80] sm:$0xff]  ;;  %v191_v7 = vld [vmem:[%s868_s26 + $0x88] sm:$0xff]  ;;  %v192_v9 = vld [vmem:[%s868_s26 + $0x90] sm:$0xff] }
  0x10   : > { %744 = vmatprep.subr.mxu0 %v207_v2  ;;  %798 = vmatprep.subr.mxu1 %v207_v2  ;;  %v177_v10 = vld [vmem:[%s868_s26 + $0x18] sm:$0xff]  ;;  %v178_v12 = vld [vmem:[%s868_s26 + $0x20] sm:$0xff]  ;;  %v179_v14 = vld [vmem:[%s868_s26 + $0x28] sm:$0xff] }
  0x11   : > { %745 = vmatpush3.msra.mxu0 %v207_v2  ;;  %802 = vmatpush3.msra.mxu1 %v207_v2  ;;  %v193_v11 = vld [vmem:[%s868_s26 + $0x98] sm:$0xff]  ;;  %v194_v13 = vld [vmem:[%s868_s26 + $0xa0] sm:$0xff]  ;;  %v195_v15 = vld [vmem:[%s868_s26 + $0xa8] sm:$0xff] }
  0x12   : > { %746 = vmatprep.subr.mxu0 %v206_v3  ;;  %799 = vmatprep.subr.mxu1 %v206_v3  ;;  %v180_v16 = vld [vmem:[%s868_s26 + $0x30] sm:$0xff]  ;;  %v181_v18 = vld [vmem:[%s868_s26 + $0x38] sm:$0xff]  ;;  %v182_v20 = vld [vmem:[%s868_s26 + $0x40] sm:$0xff] }
  0x13   : > { %747 = vmatpush3.msra.mxu0 %v206_v3  ;;  %803 = vmatpush3.msra.mxu1 %v206_v3  ;;  %v196_v17 = vld [vmem:[%s868_s26 + $0xb0] sm:$0xff]  ;;  %v197_v19 = vld [vmem:[%s868_s26 + $0xb8] sm:$0xff]  ;;  %v198_v21 = vld [vmem:[%s868_s26 + $0xc0] sm:$0xff] }
  0x14   : > { %748 = vmatprep.mubr.msk.f32.mxu0 %vm217_vm0, %v174_v4  ;;  %772 = vmatprep.mubr.msk.f32.mxu1 %vm217_vm0, %v190_v5  ;;  %v183_v22 = vld [vmem:[%s868_s26 + $0x48] sm:$0xff]  ;;  %v184_v24 = vld [vmem:[%s868_s26 + $0x50] sm:$0xff]  ;;  %v185_v26 = vld [vmem:[%s868_s26 + $0x58] sm:$0xff] }
  0x15   : > { %749 = vmatmul.mubr.msk.f32.vlgmr.msra.gmra.mxu0 %vm217_vm0, %v175_v6  ;;  %773 = vmatmul.mubr.msk.f32.vlgmr.msra.gmra.mxu1 %vm217_vm0, %v191_v7  ;;  %v199_v23 = vld [vmem:[%s868_s26 + $0xc8] sm:$0xff]  ;;  %v200_v25 = vld [vmem:[%s868_s26 + $0xd0] sm:$0xff]  ;;  %v201_v27 = vld [vmem:[%s868_s26 + $0xd8] sm:$0xff] }
  0x16   : > { %751 = vmatprep.mubr.msk.f32.mxu0 %vm217_vm0, %v176_v8  ;;  %775 = vmatprep.mubr.msk.f32.mxu1 %vm217_vm0, %v192_v9  ;;  %v186_v28 = vld [vmem:[%s868_s26 + $0x60] sm:$0xff]  ;;  %v187_v30 = vld [vmem:[%s868_s26 + $0x68] sm:$0xff]  ;;  %v188_v32 = vld [vmem:[%s868_s26 + $0x70] sm:$0xff] }
  0x17   : > { %v202_v29 = vld [vmem:[%s868_s26 + $0xe0] sm:$0xff]  ;;  %v203_v31 = vld [vmem:[%s868_s26 + $0xe8] sm:$0xff]  ;;  %v204_v33 = vld [vmem:[%s868_s26 + $0xf0] sm:$0xff] }
  0x18   : > { %v189_v34 = vld [vmem:[%s868_s26 + $0x78] sm:$0xff] }
  0x19   : > { %752 = vmatmul.mubr.msk.f32.gmra.mxu0 %vm217_vm0, %v177_v10  ;;  %776 = vmatmul.mubr.msk.f32.gmra.mxu1 %vm217_vm0, %v193_v11  ;;  %v205_v35 = vld [vmem:[%s868_s26 + $0xf8] sm:$0xff] }
  0x1a   : > { %754 = vmatprep.mubr.msk.f32.mxu0 %vm217_vm0, %v178_v12  ;;  %778 = vmatprep.mubr.msk.f32.mxu1 %vm217_vm0, %v194_v13 }
  0x1d   : > { %755 = vmatmul.mubr.msk.f32.gmra.mxu0 %vm217_vm0, %v179_v14  ;;  %779 = vmatmul.mubr.msk.f32.gmra.mxu1 %vm217_vm0, %v195_v15 }
  0x1e   : > { %757 = vmatprep.mubr.msk.f32.mxu0 %vm217_vm0, %v180_v16  ;;  %781 = vmatprep.mubr.msk.f32.mxu1 %vm217_vm0, %v196_v17 }
  0x21   : > { %758 = vmatmul.mubr.msk.f32.gmra.mxu0 %vm217_vm0, %v181_v18  ;;  %782 = vmatmul.mubr.msk.f32.gmra.mxu1 %vm217_vm0, %v197_v19 }
  0x22   : > { %760 = vmatprep.mubr.msk.f32.mxu0 %vm217_vm0, %v182_v20  ;;  %784 = vmatprep.mubr.msk.f32.mxu1 %vm217_vm0, %v198_v21 }
  0x25   : > { %761 = vmatmul.mubr.msk.f32.gmra.mxu0 %vm217_vm0, %v183_v22  ;;  %785 = vmatmul.mubr.msk.f32.gmra.mxu1 %vm217_vm0, %v199_v23 }
  0x26   : > { %763 = vmatprep.mubr.msk.f32.mxu0 %vm217_vm0, %v184_v24  ;;  %787 = vmatprep.mubr.msk.f32.mxu1 %vm217_vm0, %v200_v25 }
  0x29   : > { %764 = vmatmul.mubr.msk.f32.gmra.mxu0 %vm217_vm0, %v185_v26  ;;  %788 = vmatmul.mubr.msk.f32.gmra.mxu1 %vm217_vm0, %v201_v27 }
  0x2a   : > { %766 = vmatprep.mubr.msk.f32.mxu0 %vm217_vm0, %v186_v28  ;;  %790 = vmatprep.mubr.msk.f32.mxu1 %vm217_vm0, %v202_v29 }
  0x2d   : > { %767 = vmatmul.mubr.msk.f32.gmra.mxu0 %vm217_vm0, %v187_v30  ;;  %791 = vmatmul.mubr.msk.f32.gmra.mxu1 %vm217_vm0, %v203_v31 }
  0x2e   : > { %769 = vmatprep.mubr.msk.f32.mxu0 %vm217_vm0, %v188_v32  ;;  %793 = vmatprep.mubr.msk.f32.mxu1 %vm217_vm0, %v204_v33 }
  0x31   : > { %770 = vmatmul.mubr.msk.f32.gmra.mxu0 %vm217_vm0, %v189_v34  ;;  %794 = vmatmul.mubr.msk.f32.gmra.mxu1 %vm217_vm0, %v205_v35 }
  0xd5   : > { %v750_v37 = vpop.f32.mrf.mxu0  ;;  %v774_v38 = vpop.f32.mrf.mxu1 }
  0xd6   : > { %v386_v39 = vadd.f32 %v750_v37, %v937_v36  ;;  %v466_v40 = vadd.f32 %v774_v38, %v937_v36 }
  0xd7   : > { %v380_v41 = vpop.f32.mrf.mxu0  ;;  %v460_v42 = vpop.f32.mrf.mxu1 }
  0xd8   : > { %v540_v43 = vmax.f32 %v386_v39, 0.0  ;;  %v556_v44 = vmax.f32 %v466_v40, 0.0  ;;  %v381_v45 = vadd.f32 %v937_v36, %v380_v41  ;;  %v461_v46 = vadd.f32 %v937_v36, %v460_v42 }
  0xd9   : > { %v753_v47 = vpop.f32.mrf.mxu0  ;;  %v777_v48 = vpop.f32.mrf.mxu1 }
  0xda   : > { %573 = vst.msk [vmem:[%s946_s4 + $0x8] sm:$0xff] %vm571_vm1, %v540_v43  ;;  %589 = vst.msk [vmem:[%s946_s4 + $0x88] sm:$0xff] %vm571_vm1, %v556_v44  ;;  %v539_v49 = vmax.f32 %v381_v45, 0.0  ;;  %v555_v50 = vmax.f32 %v461_v46, 0.0  ;;  %v396_v51 = vadd.f32 %v753_v47, %v937_v36  ;;  %v476_v52 = vadd.f32 %v777_v48, %v937_v36 }
  0xdb   : > { %v390_v53 = vpop.f32.mrf.mxu0  ;;  %v470_v54 = vpop.f32.mrf.mxu1 }
  0xdc   : > { %572 = vst.msk [vmem:[%s946_s4] sm:$0xff] %vm571_vm1, %v539_v49  ;;  %588 = vst.msk [vmem:[%s946_s4 + $0x80] sm:$0xff] %vm571_vm1, %v555_v50  ;;  %v542_v55 = vmax.f32 %v396_v51, 0.0  ;;  %v558_v56 = vmax.f32 %v476_v52, 0.0  ;;  %v391_v57 = vadd.f32 %v937_v36, %v390_v53  ;;  %v471_v58 = vadd.f32 %v937_v36, %v470_v54 }
  0xdd   : > { %v756_v59 = vpop.f32.mrf.mxu0  ;;  %v780_v60 = vpop.f32.mrf.mxu1 }
  0xde   : > { %575 = vst.msk [vmem:[%s946_s4 + $0x18] sm:$0xff] %vm571_vm1, %v542_v55  ;;  %591 = vst.msk [vmem:[%s946_s4 + $0x98] sm:$0xff] %vm571_vm1, %v558_v56  ;;  %v541_v61 = vmax.f32 %v391_v57, 0.0  ;;  %v557_v62 = vmax.f32 %v471_v58, 0.0  ;;  %v406_v63 = vadd.f32 %v756_v59, %v937_v36  ;;  %v486_v0 = vadd.f32 %v780_v60, %v937_v36 }
  0xdf   : > { %v400_v1 = vpop.f32.mrf.mxu0  ;;  %v480_v2 = vpop.f32.mrf.mxu1 }
  0xe0   : > { %574 = vst.msk [vmem:[%s946_s4 + $0x10] sm:$0xff] %vm571_vm1, %v541_v61  ;;  %590 = vst.msk [vmem:[%s946_s4 + $0x90] sm:$0xff] %vm571_vm1, %v557_v62  ;;  %v544_v3 = vmax.f32 %v406_v63, 0.0  ;;  %v560_v4 = vmax.f32 %v486_v0, 0.0  ;;  %v401_v5 = vadd.f32 %v937_v36, %v400_v1  ;;  %v481_v6 = vadd.f32 %v937_v36, %v480_v2 }
  0xe1   : > { %v759_v7 = vpop.f32.mrf.mxu0  ;;  %v783_v8 = vpop.f32.mrf.mxu1 }
  0xe2   : > { %577 = vst.msk [vmem:[%s946_s4 + $0x28] sm:$0xff] %vm571_vm1, %v544_v3  ;;  %593 = vst.msk [vmem:[%s946_s4 + $0xa8] sm:$0xff] %vm571_vm1, %v560_v4  ;;  %v543_v9 = vmax.f32 %v401_v5, 0.0  ;;  %v559_v10 = vmax.f32 %v481_v6, 0.0  ;;  %v416_v11 = vadd.f32 %v759_v7, %v937_v36  ;;  %v496_v12 = vadd.f32 %v783_v8, %v937_v36 }
  0xe3   : > { %v410_v13 = vpop.f32.mrf.mxu0  ;;  %v490_v14 = vpop.f32.mrf.mxu1 }
  0xe4   : > { %576 = vst.msk [vmem:[%s946_s4 + $0x20] sm:$0xff] %vm571_vm1, %v543_v9  ;;  %592 = vst.msk [vmem:[%s946_s4 + $0xa0] sm:$0xff] %vm571_vm1, %v559_v10  ;;  %v546_v15 = vmax.f32 %v416_v11, 0.0  ;;  %v562_v16 = vmax.f32 %v496_v12, 0.0  ;;  %v411_v17 = vadd.f32 %v937_v36, %v410_v13  ;;  %v491_v18 = vadd.f32 %v937_v36, %v490_v14 }
  0xe5   : > { %v762_v19 = vpop.f32.mrf.mxu0  ;;  %v786_v20 = vpop.f32.mrf.mxu1 }
  0xe6   : > { %579 = vst.msk [vmem:[%s946_s4 + $0x38] sm:$0xff] %vm571_vm1, %v546_v15  ;;  %595 = vst.msk [vmem:[%s946_s4 + $0xb8] sm:$0xff] %vm571_vm1, %v562_v16  ;;  %v545_v21 = vmax.f32 %v411_v17, 0.0  ;;  %v561_v22 = vmax.f32 %v491_v18, 0.0  ;;  %v426_v23 = vadd.f32 %v762_v19, %v937_v36  ;;  %v506_v24 = vadd.f32 %v786_v20, %v937_v36 }
  0xe7   : > { %v420_v25 = vpop.f32.mrf.mxu0  ;;  %v500_v26 = vpop.f32.mrf.mxu1 }
  0xe8   : > { %578 = vst.msk [vmem:[%s946_s4 + $0x30] sm:$0xff] %vm571_vm1, %v545_v21  ;;  %594 = vst.msk [vmem:[%s946_s4 + $0xb0] sm:$0xff] %vm571_vm1, %v561_v22  ;;  %v548_v27 = vmax.f32 %v426_v23, 0.0  ;;  %v564_v28 = vmax.f32 %v506_v24, 0.0  ;;  %v421_v29 = vadd.f32 %v937_v36, %v420_v25  ;;  %v501_v30 = vadd.f32 %v937_v36, %v500_v26 }
  0xe9   : > { %v765_v31 = vpop.f32.mrf.mxu0  ;;  %v789_v32 = vpop.f32.mrf.mxu1 }
  0xea   : > { %581 = vst.msk [vmem:[%s946_s4 + $0x48] sm:$0xff] %vm571_vm1, %v548_v27  ;;  %597 = vst.msk [vmem:[%s946_s4 + $0xc8] sm:$0xff] %vm571_vm1, %v564_v28  ;;  %v547_v33 = vmax.f32 %v421_v29, 0.0  ;;  %v563_v34 = vmax.f32 %v501_v30, 0.0  ;;  %v436_v35 = vadd.f32 %v765_v31, %v937_v36  ;;  %v516_v37 = vadd.f32 %v789_v32, %v937_v36 }
  0xeb   : > { %v430_v38 = vpop.f32.mrf.mxu0  ;;  %v510_v39 = vpop.f32.mrf.mxu1 }
  0xec   : > { %580 = vst.msk [vmem:[%s946_s4 + $0x40] sm:$0xff] %vm571_vm1, %v547_v33  ;;  %596 = vst.msk [vmem:[%s946_s4 + $0xc0] sm:$0xff] %vm571_vm1, %v563_v34  ;;  %v550_v40 = vmax.f32 %v436_v35, 0.0  ;;  %v566_v41 = vmax.f32 %v516_v37, 0.0  ;;  %v431_v42 = vadd.f32 %v937_v36, %v430_v38  ;;  %v511_v43 = vadd.f32 %v937_v36, %v510_v39 }
  0xed   : > { %v768_v44 = vpop.f32.mrf.mxu0  ;;  %v792_v45 = vpop.f32.mrf.mxu1 }
  0xee   : > { %583 = vst.msk [vmem:[%s946_s4 + $0x58] sm:$0xff] %vm571_vm1, %v550_v40  ;;  %599 = vst.msk [vmem:[%s946_s4 + $0xd8] sm:$0xff] %vm571_vm1, %v566_v41  ;;  %v549_v46 = vmax.f32 %v431_v42, 0.0  ;;  %v565_v47 = vmax.f32 %v511_v43, 0.0  ;;  %v446_v48 = vadd.f32 %v768_v44, %v937_v36  ;;  %v526_v49 = vadd.f32 %v792_v45, %v937_v36 }
  0xef   : > { %v440_v50 = vpop.f32.mrf.mxu0  ;;  %v520_v51 = vpop.f32.mrf.mxu1 }
  0xf0   : > { %582 = vst.msk [vmem:[%s946_s4 + $0x50] sm:$0xff] %vm571_vm1, %v549_v46  ;;  %598 = vst.msk [vmem:[%s946_s4 + $0xd0] sm:$0xff] %vm571_vm1, %v565_v47  ;;  %v552_v52 = vmax.f32 %v446_v48, 0.0  ;;  %v568_v53 = vmax.f32 %v526_v49, 0.0  ;;  %v441_v54 = vadd.f32 %v937_v36, %v440_v50  ;;  %v521_v55 = vadd.f32 %v937_v36, %v520_v51 }
  0xf1   : > { %v771_v56 = vpop.f32.mrf.mxu0  ;;  %v795_v57 = vpop.f32.mrf.mxu1 }
  0xf2   : > { %585 = vst.msk [vmem:[%s946_s4 + $0x68] sm:$0xff] %vm571_vm1, %v552_v52  ;;  %601 = vst.msk [vmem:[%s946_s4 + $0xe8] sm:$0xff] %vm571_vm1, %v568_v53  ;;  %v551_v58 = vmax.f32 %v441_v54, 0.0  ;;  %v567_v59 = vmax.f32 %v521_v55, 0.0  ;;  %v456_v60 = vadd.f32 %v771_v56, %v937_v36  ;;  %v536_v61 = vadd.f32 %v795_v57, %v937_v36 }
  0xf3   : > { %v450_v62 = vpop.f32.mrf.mxu0  ;;  %v530_v63 = vpop.f32.mrf.mxu1 }
  0xf4   : > { %584 = vst.msk [vmem:[%s946_s4 + $0x60] sm:$0xff] %vm571_vm1, %v551_v58  ;;  %600 = vst.msk [vmem:[%s946_s4 + $0xe0] sm:$0xff] %vm571_vm1, %v567_v59  ;;  %v554_v0 = vmax.f32 %v456_v60, 0.0  ;;  %v570_v1 = vmax.f32 %v536_v61, 0.0  ;;  %v451_v2 = vadd.f32 %v937_v36, %v450_v62  ;;  %v531_v3 = vadd.f32 %v937_v36, %v530_v63 }
  0xf6   : > { %587 = vst.msk [vmem:[%s946_s4 + $0x78] sm:$0xff] %vm571_vm1, %v554_v0  ;;  %603 = vst.msk [vmem:[%s946_s4 + $0xf8] sm:$0xff] %vm571_vm1, %v570_v1  ;;  %v553_v4 = vmax.f32 %v451_v2, 0.0  ;;  %v569_v5 = vmax.f32 %v531_v3, 0.0 }
  0xf8   : > { %586 = vst.msk [vmem:[%s946_s4 + $0x70] sm:$0xff] %vm571_vm1, %v553_v4  ;;  %602 = vst.msk [vmem:[%s946_s4 + $0xf0] sm:$0xff] %vm571_vm1, %v569_v5 }
  0xf9 PF: > { %s13_s12 = sadd.s32 1, %s818_s12  }
  0xfa   : > { %p10_p4 = scmp.ge.s32.totalorder %s13_s12, 4  }
  0xfc   :  { %12 = sbr.rel (!%p10_p4) target bundleno = 1 (0x1), region = 62 }

// kernel: forward.9
= control target key start
LH: loop header
LB: loop body
LE: loop exit
PB: predicated region body
PF: predicated region fallthrough
CT: control target
= control target key end

     0   :  { %vm214_vm0 = vcmask 130048   ;;  %s539_s1 = inlined_call_operand.vmem [shape: f32[128,16], index: 1, kind: input, shape index: {}]   ;;  %s540_s0 = inlined_call_operand.vmem [shape: f32[128,128], index: 0, kind: input, shape index: {}]   ;;  %s541_s2 = inlined_call_operand.vmem [shape: f32[1,16], index: 2, kind: input, shape index: {}]   ;;  %s542_s3 = inlined_call_operand.vmem [shape: f32[128,16], index: 3, kind: output, shape index: {}]  }
   0x1   :  { %v45_v0 = vld [vmem:[%s539_s1 + $0x78] sm:$0xff]  ;;  %v44_v1 = vld [vmem:[%s539_s1 + $0x70] sm:$0xff]  ;;  %v43_v2 = vld [vmem:[%s539_s1 + $0x68] sm:$0xff] }
   0x2   :  { %268 = vmatprep.subr.mxu0 %v45_v0  ;;  %324 = vmatprep.subr.mxu1 %v45_v0  ;;  %v42_v3 = vld [vmem:[%s539_s1 + $0x60] sm:$0xff]  ;;  %v41_v4 = vld [vmem:[%s539_s1 + $0x58] sm:$0xff]  ;;  %v40_v5 = vld [vmem:[%s539_s1 + $0x50] sm:$0xff] }
   0x3   :  { %269 = vmatpush3.msra.mxu0 %v45_v0  ;;  %340 = vmatpush3.msra.mxu1 %v45_v0  ;;  %v39_v6 = vld [vmem:[%s539_s1 + $0x48] sm:$0xff]  ;;  %v38_v7 = vld [vmem:[%s539_s1 + $0x40] sm:$0xff]  ;;  %v37_v8 = vld [vmem:[%s539_s1 + $0x38] sm:$0xff] }
   0x4   :  { %270 = vmatprep.subr.mxu0 %v44_v1  ;;  %325 = vmatprep.subr.mxu1 %v44_v1  ;;  %v36_v9 = vld [vmem:[%s539_s1 + $0x30] sm:$0xff]  ;;  %v35_v10 = vld [vmem:[%s539_s1 + $0x28] sm:$0xff]  ;;  %v34_v11 = vld [vmem:[%s539_s1 + $0x20] sm:$0xff] }
   0x5   :  { %271 = vmatpush3.msra.mxu0 %v44_v1  ;;  %341 = vmatpush3.msra.mxu1 %v44_v1  ;;  %v33_v12 = vld [vmem:[%s539_s1 + $0x18] sm:$0xff]  ;;  %v32_v13 = vld [vmem:[%s539_s1 + $0x10] sm:$0xff]  ;;  %v31_v14 = vld [vmem:[%s539_s1 + $0x8] sm:$0xff] }
   0x6   :  { %272 = vmatprep.subr.mxu0 %v43_v2  ;;  %326 = vmatprep.subr.mxu1 %v43_v2  ;;  %v30_v15 = vld [vmem:[%s539_s1] sm:$0xff]  ;;  %v15_v18 = vld [vmem:[%s540_s0 + $0x8] sm:$0xff]  ;;  %v16_v20 = vld [vmem:[%s540_s0 + $0x10] sm:$0xff] }
   0x7   :  { %273 = vmatpush3.msra.mxu0 %v43_v2  ;;  %342 = vmatpush3.msra.mxu1 %v43_v2  ;;  %v14_v16 = vld [vmem:[%s540_s0] sm:$0xff]  ;;  %v23_v19 = vld [vmem:[%s540_s0 + $0x48] sm:$0xff]  ;;  %v24_v21 = vld [vmem:[%s540_s0 + $0x50] sm:$0xff] }
   0x8   :  { %274 = vmatprep.subr.mxu0 %v42_v3  ;;  %327 = vmatprep.subr.mxu1 %v42_v3  ;;  %v22_v17 = vld [vmem:[%s540_s0 + $0x40] sm:$0xff]  ;;  %v17_v22 = vld [vmem:[%s540_s0 + $0x18] sm:$0xff]  ;;  %v19_v26 = vld [vmem:[%s540_s0 + $0x28] sm:$0xff] }
   0x9   :  { %275 = vmatpush3.msra.mxu0 %v42_v3  ;;  %343 = vmatpush3.msra.mxu1 %v42_v3  ;;  %v25_v23 = vld [vmem:[%s540_s0 + $0x58] sm:$0xff]  ;;  %v18_v24 = vld [vmem:[%s540_s0 + $0x20] sm:$0xff]  ;;  %v27_v27 = vld [vmem:[%s540_s0 + $0x68] sm:$0xff] }
   0xa   :  { %276 = vmatprep.subr.mxu0 %v41_v4  ;;  %328 = vmatprep.subr.mxu1 %v41_v4  ;;  %v26_v25 = vld [vmem:[%s540_s0 + $0x60] sm:$0xff]  ;;  %v20_v28 = vld [vmem:[%s540_s0 + $0x30] sm:$0xff]  ;;  %v21_v30 = vld [vmem:[%s540_s0 + $0x38] sm:$0xff] }
   0xb   :  { %277 = vmatpush3.msra.mxu0 %v41_v4  ;;  %344 = vmatpush3.msra.mxu1 %v41_v4  ;;  %v28_v29 = vld [vmem:[%s540_s0 + $0x70] sm:$0xff]  ;;  %v29_v31 = vld [vmem:[%s540_s0 + $0x78] sm:$0xff]  ;;  %v235_v32 = vld [vmem:[%s541_s2] ss:$0 sm:$0xff] }
   0xc   :  { %278 = vmatprep.subr.mxu0 %v40_v5  ;;  %329 = vmatprep.subr.mxu1 %v40_v5 }
   0xd   :  { %279 = vmatpush3.msra.mxu0 %v40_v5  ;;  %345 = vmatpush3.msra.mxu1 %v40_v5 }
   0xe   :  { %280 = vmatprep.subr.mxu0 %v39_v6  ;;  %330 = vmatprep.subr.mxu1 %v39_v6 }
   0xf   :  { %281 = vmatpush3.msra.mxu0 %v39_v6  ;;  %346 = vmatpush3.msra.mxu1 %v39_v6 }
  0x10   :  { %282 = vmatprep.subr.mxu0 %v38_v7  ;;  %331 = vmatprep.subr.mxu1 %v38_v7 }
  0x11   :  { %283 = vmatpush3.msra.mxu0 %v38_v7  ;;  %347 = vmatpush3.msra.mxu1 %v38_v7 }
  0x12   :  { %284 = vmatprep.subr.mxu0 %v37_v8  ;;  %332 = vmatprep.subr.mxu1 %v37_v8 }
  0x13   :  { %285 = vmatpush3.msra.mxu0 %v37_v8  ;;  %348 = vmatpush3.msra.mxu1 %v37_v8 }
  0x14   :  { %286 = vmatprep.subr.mxu0 %v36_v9  ;;  %333 = vmatprep.subr.mxu1 %v36_v9 }
  0x15   :  { %287 = vmatpush3.msra.mxu0 %v36_v9  ;;  %349 = vmatpush3.msra.mxu1 %v36_v9 }
  0x16   :  { %288 = vmatprep.subr.mxu0 %v35_v10  ;;  %334 = vmatprep.subr.mxu1 %v35_v10 }
  0x17   :  { %289 = vmatpush3.msra.mxu0 %v35_v10  ;;  %350 = vmatpush3.msra.mxu1 %v35_v10 }
  0x18   :  { %290 = vmatprep.subr.mxu0 %v34_v11  ;;  %335 = vmatprep.subr.mxu1 %v34_v11 }
  0x19   :  { %291 = vmatpush3.msra.mxu0 %v34_v11  ;;  %351 = vmatpush3.msra.mxu1 %v34_v11 }
  0x1a   :  { %292 = vmatprep.subr.mxu0 %v33_v12  ;;  %336 = vmatprep.subr.mxu1 %v33_v12 }
  0x1b   :  { %293 = vmatpush3.msra.mxu0 %v33_v12  ;;  %352 = vmatpush3.msra.mxu1 %v33_v12 }
  0x1c   :  { %294 = vmatprep.subr.mxu0 %v32_v13  ;;  %337 = vmatprep.subr.mxu1 %v32_v13 }
  0x1d   :  { %295 = vmatpush3.msra.mxu0 %v32_v13  ;;  %353 = vmatpush3.msra.mxu1 %v32_v13 }
  0x1e   :  { %296 = vmatprep.subr.mxu0 %v31_v14  ;;  %338 = vmatprep.subr.mxu1 %v31_v14 }
  0x1f   :  { %297 = vmatpush3.msra.mxu0 %v31_v14  ;;  %354 = vmatpush3.msra.mxu1 %v31_v14 }
  0x20   :  { %298 = vmatprep.subr.mxu0 %v30_v15  ;;  %339 = vmatprep.subr.mxu1 %v30_v15 }
  0x21   :  { %299 = vmatpush3.msra.mxu0 %v30_v15  ;;  %355 = vmatpush3.msra.mxu1 %v30_v15 }
  0x22   :  { %300 = vmatprep.mubr.f32.mxu0 %v14_v16  ;;  %312 = vmatprep.mubr.f32.mxu1 %v22_v17 }
  0x23   :  { %301 = vmatmul.mubr.f32.vlgmr.msra.gmra.mxu0 %v15_v18  ;;  %313 = vmatmul.mubr.f32.vlgmr.msra.gmra.mxu1 %v23_v19 }
  0x24   :  { %303 = vmatprep.mubr.f32.mxu0 %v16_v20  ;;  %315 = vmatprep.mubr.f32.mxu1 %v24_v21 }
  0x27   :  { %304 = vmatmul.mubr.f32.gmra.mxu0 %v17_v22  ;;  %316 = vmatmul.mubr.f32.gmra.mxu1 %v25_v23 }
  0x28   :  { %306 = vmatprep.mubr.f32.mxu0 %v18_v24  ;;  %318 = vmatprep.mubr.f32.mxu1 %v26_v25 }
  0x2b   :  { %307 = vmatmul.mubr.f32.gmra.mxu0 %v19_v26  ;;  %319 = vmatmul.mubr.f32.gmra.mxu1 %v27_v27 }
  0x2c   :  { %309 = vmatprep.mubr.f32.mxu0 %v20_v28  ;;  %321 = vmatprep.mubr.f32.mxu1 %v28_v29 }
  0x2f   :  { %310 = vmatmul.mubr.f32.gmra.mxu0 %v21_v30  ;;  %322 = vmatmul.mubr.f32.gmra.mxu1 %v29_v31 }
  0xe3   :  { %v302_v33 = vpop.f32.mrf.mxu0  ;;  %v314_v34 = vpop.f32.mrf.mxu1 }
  0xe4   :  { %v125_v35 = vadd.f32 %v302_v33, %v235_v32  ;;  %v165_v36 = vadd.f32 %v314_v34, %v235_v32 }
  0xe5   :  { %v119_v37 = vpop.f32.mrf.mxu0  ;;  %v159_v38 = vpop.f32.mrf.mxu1 }
  0xe6   :  { %v199_v39 = vmax.f32 %v125_v35, 0.0  ;;  %v207_v40 = vmax.f32 %v165_v36, 0.0  ;;  %v120_v41 = vadd.f32 %v235_v32, %v119_v37  ;;  %v160_v42 = vadd.f32 %v235_v32, %v159_v38 }
  0xe7   :  { %v305_v43 = vpop.f32.mrf.mxu0  ;;  %v317_v44 = vpop.f32.mrf.mxu1 }
  0xe8   :  { %216 = vst.msk [vmem:[%s542_s3 + $0x8] sm:$0xff] %vm214_vm0, %v199_v39  ;;  %224 = vst.msk [vmem:[%s542_s3 + $0x48] sm:$0xff] %vm214_vm0, %v207_v40  ;;  %v198_v45 = vmax.f32 %v120_v41, 0.0  ;;  %v206_v46 = vmax.f32 %v160_v42, 0.0  ;;  %v135_v47 = vadd.f32 %v305_v43, %v235_v32  ;;  %v175_v48 = vadd.f32 %v317_v44, %v235_v32 }
  0xe9   :  { %v129_v49 = vpop.f32.mrf.mxu0  ;;  %v169_v50 = vpop.f32.mrf.mxu1 }
  0xea   :  { %215 = vst.msk [vmem:[%s542_s3] sm:$0xff] %vm214_vm0, %v198_v45  ;;  %223 = vst.msk [vmem:[%s542_s3 + $0x40] sm:$0xff] %vm214_vm0, %v206_v46  ;;  %v201_v51 = vmax.f32 %v135_v47, 0.0  ;;  %v209_v52 = vmax.f32 %v175_v48, 0.0  ;;  %v130_v53 = vadd.f32 %v235_v32, %v129_v49  ;;  %v170_v54 = vadd.f32 %v235_v32, %v169_v50 }
  0xeb   :  { %v308_v55 = vpop.f32.mrf.mxu0  ;;  %v320_v56 = vpop.f32.mrf.mxu1 }
  0xec   :  { %218 = vst.msk [vmem:[%s542_s3 + $0x18] sm:$0xff] %vm214_vm0, %v201_v51  ;;  %226 = vst.msk [vmem:[%s542_s3 + $0x58] sm:$0xff] %vm214_vm0, %v209_v52  ;;  %v200_v57 = vmax.f32 %v130_v53, 0.0  ;;  %v208_v58 = vmax.f32 %v170_v54, 0.0  ;;  %v145_v59 = vadd.f32 %v308_v55, %v235_v32  ;;  %v185_v60 = vadd.f32 %v320_v56, %v235_v32 }
  0xed   :  { %v139_v61 = vpop.f32.mrf.mxu0  ;;  %v179_v62 = vpop.f32.mrf.mxu1 }
  0xee   :  { %217 = vst.msk [vmem:[%s542_s3 + $0x10] sm:$0xff] %vm214_vm0, %v200_v57  ;;  %225 = vst.msk [vmem:[%s542_s3 + $0x50] sm:$0xff] %vm214_vm0, %v208_v58  ;;  %v203_v63 = vmax.f32 %v145_v59, 0.0  ;;  %v211_v0 = vmax.f32 %v185_v60, 0.0  ;;  %v140_v1 = vadd.f32 %v235_v32, %v139_v61  ;;  %v180_v2 = vadd.f32 %v235_v32, %v179_v62 }
  0xef   :  { %v311_v3 = vpop.f32.mrf.mxu0  ;;  %v323_v4 = vpop.f32.mrf.mxu1 }
  0xf0   :  { %220 = vst.msk [vmem:[%s542_s3 + $0x28] sm:$0xff] %vm214_vm0, %v203_v63  ;;  %228 = vst.msk [vmem:[%s542_s3 + $0x68] sm:$0xff] %vm214_vm0, %v211_v0  ;;  %v202_v5 = vmax.f32 %v140_v1, 0.0  ;;  %v210_v6 = vmax.f32 %v180_v2, 0.0  ;;  %v155_v7 = vadd.f32 %v311_v3, %v235_v32  ;;  %v195_v8 = vadd.f32 %v323_v4, %v235_v32 }
  0xf1   :  { %v149_v9 = vpop.f32.mrf.mxu0  ;;  %v189_v10 = vpop.f32.mrf.mxu1 }
  0xf2   :  { %219 = vst.msk [vmem:[%s542_s3 + $0x20] sm:$0xff] %vm214_vm0, %v202_v5  ;;  %227 = vst.msk [vmem:[%s542_s3 + $0x60] sm:$0xff] %vm214_vm0, %v210_v6  ;;  %v205_v11 = vmax.f32 %v155_v7, 0.0  ;;  %v213_v12 = vmax.f32 %v195_v8, 0.0  ;;  %v150_v13 = vadd.f32 %v235_v32, %v149_v9  ;;  %v190_v14 = vadd.f32 %v235_v32, %v189_v10 }
  0xf4   :  { %222 = vst.msk [vmem:[%s542_s3 + $0x38] sm:$0xff] %vm214_vm0, %v205_v11  ;;  %230 = vst.msk [vmem:[%s542_s3 + $0x78] sm:$0xff] %vm214_vm0, %v213_v12  ;;  %v204_v15 = vmax.f32 %v150_v13, 0.0  ;;  %v212_v16 = vmax.f32 %v190_v14, 0.0 }
  0xf6   :  { %221 = vst.msk [vmem:[%s542_s3 + $0x30] sm:$0xff] %vm214_vm0, %v204_v15  ;;  %229 = vst.msk [vmem:[%s542_s3 + $0x70] sm:$0xff] %vm214_vm0, %v212_v16 }

// kernel: forward.10
= control target key start
LH: loop header
LB: loop body
LE: loop exit
PB: predicated region body
PF: predicated region fallthrough
CT: control target
= control target key end

     0   :  { %vm159_vm0 = vcmask 261120   ;;  %v1696_v18 = vmov 0.0   ;;  %vm498_vm1 = vcmask 130048   ;;  %s1697_s18 = smov 32   ;;  %s2809_s3 = inlined_call_operand.vmem [shape: f32[288,128], index: 3, kind: input, shape index: {}]   ;;  %s2810_s1 = inlined_call_operand.vmem [shape: f32[128,288], index: 1, kind: input, shape index: {}]   ;;  %s2811_s2 = inlined_call_operand.vmem [shape: f32[144,128], index: 2, kind: input, shape index: {}]   ;;  %s2812_s0 = inlined_call_operand.vmem [shape: f32[128,144], index: 0, kind: input, shape index: {}]   ;;  %s2813_s5 = inlined_call_operand.vmem [shape: f32[128,32], index: 5, kind: input, shape index: {}, may-alias: {5,7}]   ;;  %s2814_s4 = inlined_call_operand.vmem [shape: f32[1,128], index: 4, kind: input, shape index: {}]   ;;  %s2815_s7 = inlined_call_operand.vmem [shape: f32[128,32], index: 7, kind: output, shape index: {1}, may-alias: {5,7}]   ;;  %s2816_s6 = inlined_call_operand.vmem [shape: f32[128,32], index: 6, kind: output, shape index: {0}]  }
   0x1   :  { %v154_v0 = vld [vmem:[%s2809_s3 + $0xf8] sm:$0xff]  ;;  %v153_v3 = vld [vmem:[%s2809_s3 + $0xf0] sm:$0xff]  ;;  %v152_v6 = vld [vmem:[%s2809_s3 + $0xe8] sm:$0xff] }
   0x2   :  { %v158_v1 = vld [vmem:[%s2809_s3 + $0x118] sm:$0xff]  ;;  %1396 = vmatprep.subr.mxu0 %v154_v0  ;;  %v157_v4 = vld [vmem:[%s2809_s3 + $0x110] sm:$0xff]  ;;  %v156_v7 = vld [vmem:[%s2809_s3 + $0x108] sm:$0xff] }
   0x3   :  { %v138_v2 = vld [vmem:[%s2809_s3 + $0x78] sm:$0xff]  ;;  %1496 = vmatprep.subr.mxu1 %v158_v1  ;;  %v137_v5 = vld [vmem:[%s2809_s3 + $0x70] sm:$0xff]  ;;  %v136_v8 = vld [vmem:[%s2809_s3 + $0x68] sm:$0xff] }
   0x4   :  { %1397 = vmatpush3.msra.mxu0 %v138_v2  ;;  %1497 = vmatpush3.msra.mxu1 %v158_v1  ;;  %v151_v9 = vld [vmem:[%s2809_s3 + $0xe0] sm:$0xff]  ;;  %v77_v12 = vld [vmem:[%s2810_s1 + $0x10] sm:$0xff]  ;;  %v150_v13 = vld [vmem:[%s2809_s3 + $0xd8] sm:$0xff] }
   0x5   :  { %1398 = vmatprep.subr.mxu0 %v153_v3  ;;  %1498 = vmatprep.subr.mxu1 %v157_v4  ;;  %v155_v10 = vld [vmem:[%s2809_s3 + $0x100] sm:$0xff]  ;;  %v80_v14 = vld [vmem:[%s2810_s1 + $0x28] sm:$0xff]  ;;  %v134_v15 = vld [vmem:[%s2809_s3 + $0x58] sm:$0xff] }
   0x6   :  { %1399 = vmatpush3.msra.mxu0 %v137_v5  ;;  %1499 = vmatpush3.msra.mxu1 %v157_v4  ;;  %v135_v11 = vld [vmem:[%s2809_s3 + $0x60] sm:$0xff]  ;;  %v1791_v16 = vld [vmem:[%s2811_s2 + $0x78] sm:$0xff]  ;;  %v149_v17 = vld [vmem:[%s2809_s3 + $0xd0] sm:$0xff] }
   0x7   :  { %1400 = vmatprep.subr.mxu0 %v152_v6  ;;  %1500 = vmatprep.subr.mxu1 %v156_v7  ;;  %v133_v19 = vld [vmem:[%s2809_s3 + $0x50] sm:$0xff]  ;;  %v148_v21 = vld [vmem:[%s2809_s3 + $0xc8] sm:$0xff]  ;;  %v147_v24 = vld [vmem:[%s2809_s3 + $0xc0] sm:$0xff] }
   0x8   :  { %1401 = vmatpush3.msra.mxu0 %v136_v8  ;;  %1501 = vmatpush3.msra.mxu1 %v156_v7  ;;  %v1805_v20 = vld [vmem:[%s2811_s2 + $0x70] sm:$0xff]  ;;  %v132_v22 = vld [vmem:[%s2809_s3 + $0x48] sm:$0xff]  ;;  %v83_v25 = vld [vmem:[%s2810_s1 + $0x40] sm:$0xff] }
   0x9   :  { %1402 = vmatprep.subr.mxu0 %v151_v9  ;;  %1502 = vmatprep.subr.mxu1 %v155_v10  ;;  %v1818_v23 = vld [vmem:[%s2811_s2 + $0x68] sm:$0xff]  ;;  %v131_v26 = vld [vmem:[%s2809_s3 + $0x40] sm:$0xff]  ;;  %v86_v27 = vld [vmem:[%s2810_s1 + $0x58] sm:$0xff] }
   0xa   :  { %1403 = vmatpush3.msra.mxu0 %v135_v11  ;;  %1503 = vmatpush3.msra.mxu1 %v155_v10  ;;  %v146_v28 = vld [vmem:[%s2809_s3 + $0xb8] sm:$0xff]  ;;  %v1842_v29 = vld [vmem:[%s2811_s2 + $0x60] sm:$0xff]  ;;  %v145_v31 = vld [vmem:[%s2809_s3 + $0xb0] sm:$0xff] }
   0xb   :  { %1504 = vmatprep.mubr.msk.f32.mxu1 %vm159_vm0, %v77_v12  ;;  %1404 = vmatprep.subr.mxu0 %v150_v13  ;;  %v130_v30 = vld [vmem:[%s2809_s3 + $0x38] sm:$0xff]  ;;  %v89_v33 = vld [vmem:[%s2810_s1 + $0x70] sm:$0xff]  ;;  %v92_v35 = vld [vmem:[%s2810_s1 + $0x88] sm:$0xff] }
   0xc   :  { %1505 = vmatmul.mubr.msk.f32.vlgmr.msra.gmra.mxu1 %vm159_vm0, %v80_v14  ;;  %1528 = vmatprep.subr.mxu1 %v1696_v18  ;;  %v1855_v32 = vld [vmem:[%s2811_s2 + $0x58] sm:$0xff]  ;;  %v129_v34 = vld [vmem:[%s2809_s3 + $0x30] sm:$0xff]  ;;  %v144_v36 = vld [vmem:[%s2809_s3 + $0xa8] sm:$0xff] }
   0xd   :  { %1405 = vmatpush3.msra.mxu0 %v134_v15  ;;  %1546 = vmatpush1.msra.mxu1 %v1791_v16  ;;  %v1876_v37 = vld [vmem:[%s2811_s2 + $0x50] sm:$0xff]  ;;  %v128_v38 = vld [vmem:[%s2809_s3 + $0x28] sm:$0xff]  ;;  %v143_v39 = vld [vmem:[%s2809_s3 + $0xa0] sm:$0xff] }
   0xe   :  { %1406 = vmatprep.subr.mxu0 %v149_v17  ;;  %1529 = vmatprep.subr.mxu1 %v1696_v18  ;;  %v1889_v40 = vld [vmem:[%s2811_s2 + $0x48] sm:$0xff]  ;;  %v95_v41 = vld [vmem:[%s2810_s1 + $0xa0] sm:$0xff]  ;;  %v98_v43 = vld [vmem:[%s2810_s1 + $0xb8] sm:$0xff] }
   0xf   :  { %1407 = vmatpush3.msra.mxu0 %v133_v19  ;;  %1547 = vmatpush1.msra.mxu1 %v1805_v20  ;;  %v127_v42 = vld [vmem:[%s2809_s3 + $0x20] sm:$0xff]  ;;  %v142_v44 = vld [vmem:[%s2809_s3 + $0x98] sm:$0xff]  ;;  %v141_v47 = vld [vmem:[%s2809_s3 + $0x90] sm:$0xff] }
  0x10   :  { %1408 = vmatprep.subr.mxu0 %v148_v21  ;;  %1530 = vmatprep.subr.mxu1 %v1696_v18  ;;  %v1910_v45 = vld [vmem:[%s2811_s2 + $0x40] sm:$0xff]  ;;  %v126_v46 = vld [vmem:[%s2809_s3 + $0x18] sm:$0xff]  ;;  %v101_v49 = vld [vmem:[%s2810_s1 + $0xd0] sm:$0xff] }
  0x11   :  { %1409 = vmatpush3.msra.mxu0 %v132_v22  ;;  %1548 = vmatpush1.msra.mxu1 %v1818_v23  ;;  %v1923_v48 = vld [vmem:[%s2811_s2 + $0x38] sm:$0xff]  ;;  %v125_v50 = vld [vmem:[%s2809_s3 + $0x10] sm:$0xff]  ;;  %v104_v51 = vld [vmem:[%s2810_s1 + $0xe8] sm:$0xff] }
  0x12   :  { %1410 = vmatprep.subr.mxu0 %v147_v24  ;;  %1507 = vmatprep.mubr.msk.f32.mxu1 %vm159_vm0, %v83_v25  ;;  %v140_v52 = vld [vmem:[%s2809_s3 + $0x88] sm:$0xff]  ;;  %v1944_v53 = vld [vmem:[%s2811_s2 + $0x30] sm:$0xff]  ;;  %v139_v55 = vld [vmem:[%s2809_s3 + $0x80] sm:$0xff] }
  0x13   :  { %1531 = vmatprep.subr.mxu1 %v1696_v18  ;;  %1411 = vmatpush3.msra.mxu0 %v131_v26  ;;  %v124_v54 = vld [vmem:[%s2809_s3 + $0x8] sm:$0xff]  ;;  %v107_v57 = vld [vmem:[%s2810_s1 + $0x100] sm:$0xff]  ;;  %v110_v60 = vld [vmem:[%s2810_s1 + $0x118] sm:$0xff] }
  0x14   :  { %1508 = vmatmul.mubr.msk.f32.gmra.mxu1 %vm159_vm0, %v86_v27  ;;  %1412 = vmatprep.subr.mxu0 %v146_v28  ;;  %v1957_v56 = vld [vmem:[%s2811_s2 + $0x28] sm:$0xff]  ;;  %v123_v58 = vld [vmem:[%s2809_s3] sm:$0xff]  ;;  %v1988_v63 = vld [vmem:[%s2811_s2 + $0x18] sm:$0xff] }
  0x15   :  { %1549 = vmatpush1.msra.mxu1 %v1842_v29  ;;  %1413 = vmatpush3.msra.mxu0 %v130_v30  ;;  %v76_v59 = vld [vmem:[%s2810_s1 + $0x8] sm:$0xff]  ;;  %v1978_v61 = vld [vmem:[%s2811_s2 + $0x20] sm:$0xff]  ;;  %v113_v0 = vld [vmem:[%s2810_s1 + $0x130] sm:$0xff] }
  0x16   :  { %1532 = vmatprep.subr.mxu1 %v1696_v18  ;;  %1414 = vmatprep.subr.mxu0 %v145_v31  ;;  %v75_v62 = vld [vmem:[%s2810_s1] sm:$0xff]  ;;  %v116_v2 = vld [vmem:[%s2810_s1 + $0x148] sm:$0xff]  ;;  %v2007_v3 = vld [vmem:[%s2811_s2 + $0x10] sm:$0xff] }
  0x17   :  { %1550 = vmatpush1.msra.mxu1 %v1855_v32  ;;  %1510 = vmatprep.mubr.msk.f32.mxu1 %vm159_vm0, %v89_v33  ;;  %v79_v1 = vld [vmem:[%s2810_s1 + $0x20] sm:$0xff]  ;;  %v78_v4 = vld [vmem:[%s2810_s1 + $0x18] sm:$0xff]  ;;  %v2018_v5 = vld [vmem:[%s2811_s2 + $0x8] sm:$0xff] }
  0x18   :  { %1533 = vmatprep.subr.mxu1 %v1696_v18  ;;  %1415 = vmatpush3.msra.mxu0 %v129_v34  ;;  %v119_v6 = vld [vmem:[%s2810_s1 + $0x160] sm:$0xff]  ;;  %v82_v7 = vld [vmem:[%s2810_s1 + $0x38] sm:$0xff]  ;;  %v81_v10 = vld [vmem:[%s2810_s1 + $0x30] sm:$0xff] }
  0x19   :  { %1511 = vmatmul.mubr.msk.f32.gmra.mxu1 %vm159_vm0, %v92_v35  ;;  %1416 = vmatprep.subr.mxu0 %v144_v36  ;;  %v122_v8 = vld [vmem:[%s2810_s1 + $0x178] sm:$0xff]  ;;  %v2037_v9 = vld [vmem:[%s2811_s2] sm:$0xff]  ;;  %v2048_v11 = vld [vmem:[%s2811_s2 + $0x88] sm:$0xff] }
  0x1a   :  { %1551 = vmatpush1.msra.mxu1 %v1876_v37  ;;  %1417 = vmatpush3.msra.mxu0 %v128_v38  ;;  %v85_v12 = vld [vmem:[%s2810_s1 + $0x50] sm:$0xff]  ;;  %v2059_v13 = vld [vmem:[%s2811_s2 + $0x80] sm:$0xff]  ;;  %v28_v14 = vld [vmem:[%s2812_s0 + $0x18] sm:$0xff] }
  0x1b   :  { %1534 = vmatprep.subr.mxu1 %v1696_v18  ;;  %1418 = vmatprep.subr.mxu0 %v143_v39  ;;  %v84_v15 = vld [vmem:[%s2810_s1 + $0x48] sm:$0xff]  ;;  %v29_v21 = vld [vmem:[%s2812_s0 + $0x20] sm:$0xff]  ;;  %v90_v25 = vld [vmem:[%s2810_s1 + $0x78] sm:$0xff] }
  0x1c   :  { %1552 = vmatpush1.msra.mxu1 %v1889_v40  ;;  %1513 = vmatprep.mubr.msk.f32.mxu1 %vm159_vm0, %v95_v41  ;;  %v88_v17 = vld [vmem:[%s2810_s1 + $0x68] sm:$0xff]  ;;  %v91_v22 = vld [vmem:[%s2810_s1 + $0x80] sm:$0xff]  ;;  %v31_v26 = vld [vmem:[%s2812_s0 + $0x30] sm:$0xff] }
  0x1d   :  { %1535 = vmatprep.subr.mxu1 %v1696_v18  ;;  %1419 = vmatpush3.msra.mxu0 %v127_v42  ;;  %v30_v19 = vld [vmem:[%s2812_s0 + $0x28] sm:$0xff]  ;;  %v94_v27 = vld [vmem:[%s2810_s1 + $0x98] sm:$0xff]  ;;  %v33_v30 = vld [vmem:[%s2812_s0 + $0x40] sm:$0xff] }
  0x1e   :  { %1514 = vmatmul.mubr.msk.f32.gmra.mxu1 %vm159_vm0, %v98_v43  ;;  %1420 = vmatprep.subr.mxu0 %v142_v44  ;;  %v828_v24 = vld [vmem:[%s2813_s5 + $0x8] sm:$0xff]  ;;  %v97_v31 = vld [vmem:[%s2810_s1 + $0xb0] sm:$0xff]  ;;  %v37_v38 = vld [vmem:[%s2812_s0 + $0x60] sm:$0xff] }
  0x1f   :  { %1553 = vmatpush1.msra.mxu1 %v1910_v45  ;;  %1421 = vmatpush3.msra.mxu0 %v126_v46  ;;  %v34_v28 = vld [vmem:[%s2812_s0 + $0x48] sm:$0xff]  ;;  %v35_v34 = vld [vmem:[%s2812_s0 + $0x50] sm:$0xff]  ;;  %v103_v39 = vld [vmem:[%s2810_s1 + $0xe0] sm:$0xff] }
  0x20   :  { %1536 = vmatprep.subr.mxu1 %v1696_v18  ;;  %1422 = vmatprep.subr.mxu0 %v141_v47  ;;  %v96_v33 = vld [vmem:[%s2810_s1 + $0xa8] sm:$0xff]  ;;  %v102_v41 = vld [vmem:[%s2810_s1 + $0xd8] sm:$0xff]  ;;  %v39_v42 = vld [vmem:[%s2812_s0 + $0x70] sm:$0xff] }
  0x21   :  { %1554 = vmatpush1.msra.mxu1 %v1923_v48  ;;  %1516 = vmatprep.mubr.msk.f32.mxu1 %vm159_vm0, %v101_v49  ;;  %v100_v35 = vld [vmem:[%s2810_s1 + $0xc8] sm:$0xff]  ;;  %v106_v43 = vld [vmem:[%s2810_s1 + $0xf8] sm:$0xff]  ;;  %v41_v46 = vld [vmem:[%s2812_s0 + $0x80] sm:$0xff] }
  0x22   :  { %1537 = vmatprep.subr.mxu1 %v1696_v18  ;;  %1423 = vmatpush3.msra.mxu0 %v125_v50  ;;  %v38_v36 = vld [vmem:[%s2812_s0 + $0x68] sm:$0xff]  ;;  %v109_v47 = vld [vmem:[%s2810_s1 + $0x110] sm:$0xff] }
  0x23   :  { %1517 = vmatmul.mubr.msk.f32.gmra.mxu1 %vm159_vm0, %v104_v51  ;;  %1424 = vmatprep.subr.mxu0 %v140_v52  ;;  %v42_v44 = vld [vmem:[%s2812_s0 + $0x88] sm:$0xff]  ;;  %v43_v50 = vld [vmem:[%s2812_s0 + $0x90] sm:$0xff] }
  0x24   :  { %1555 = vmatpush1.msra.mxu1 %v1944_v53  ;;  %1425 = vmatpush3.msra.mxu0 %v124_v54  ;;  %v108_v49 = vld [vmem:[%s2810_s1 + $0x108] sm:$0xff]  ;;  %v111_v54 = vld [vmem:[%s2810_s1 + $0x120] sm:$0xff] }
  0x25   :  { %1538 = vmatprep.subr.mxu1 %v1696_v18  ;;  %1426 = vmatprep.subr.mxu0 %v139_v55  ;;  %v112_v51 = vld [vmem:[%s2810_s1 + $0x128] sm:$0xff]  ;;  %v45_v55 = vld [vmem:[%s2812_s0 + $0xa0] sm:$0xff] }
  0x26   :  { %1556 = vmatpush1.msra.mxu1 %v1957_v56  ;;  %1519 = vmatprep.mubr.msk.f32.mxu1 %vm159_vm0, %v107_v57  ;;  %v46_v52 = vld [vmem:[%s2812_s0 + $0xa8] sm:$0xff]  ;;  %v48_v57 = vld [vmem:[%s2812_s0 + $0xb8] sm:$0xff] }
  0x27   :  { %1539 = vmatprep.subr.mxu1 %v1696_v18  ;;  %1427 = vmatpush3.msra.mxu0 %v123_v58  ;;  %v114_v58 = vld [vmem:[%s2810_s1 + $0x138] sm:$0xff] }
  0x28   :  { %272 = vmatprep.mubr.f32.mxu0 %v76_v59  ;;  %1520 = vmatmul.mubr.msk.f32.gmra.mxu1 %vm159_vm0, %v110_v60  ;;  %v47_v59 = vld [vmem:[%s2812_s0 + $0xb0] sm:$0xff]  ;;  %v118_v60 = vld [vmem:[%s2810_s1 + $0x158] sm:$0xff] }
  0x29   :  { %1557 = vmatpush1.msra.mxu1 %v1978_v61  ;;  %273 = vmatmul.mubr.f32.vlgmr.msra.gmra.mxu0 %v75_v62  ;;  %v117_v62 = vld [vmem:[%s2810_s1 + $0x150] sm:$0xff] }
  0x2a   :  { %547 = vmatprep.subr.mxu0 %v1696_v18  ;;  %1540 = vmatprep.subr.mxu1 %v1696_v18 }
  0x2b   :  { %548 = vmatpush1.msra.mxu0 %v1791_v16  ;;  %1558 = vmatpush1.msra.mxu1 %v1988_v63  ;;  %v27_v16 = vld [vmem:[%s2812_s0 + $0x10] sm:$0xff] }
  0x2c   :  { %1522 = vmatprep.mubr.msk.f32.mxu1 %vm159_vm0, %v113_v0  ;;  %1541 = vmatprep.subr.mxu1 %v1696_v18  ;;  %v121_v0 = vld [vmem:[%s2810_s1 + $0x170] sm:$0xff] }
  0x2d   :  { %277 = vmatprep.mubr.f32.mxu0 %v79_v1  ;;  %1523 = vmatmul.mubr.msk.f32.gmra.mxu1 %vm159_vm0, %v116_v2  ;;  %v52_v1 = vld [vmem:[%s2812_s0 + $0xd8] sm:$0xff]  ;;  %v120_v2 = vld [vmem:[%s2810_s1 + $0x168] sm:$0xff] }
  0x2e   :  { %1559 = vmatpush1.msra.mxu1 %v2007_v3  ;;  %278 = vmatmul.mubr.f32.gmra.mxu0 %v78_v4  ;;  %v26_v4 = vld [vmem:[%s2812_s0 + $0x8] sm:$0xff] }
  0x2f   :  { %549 = vmatprep.subr.mxu0 %v1696_v18  ;;  %1542 = vmatprep.subr.mxu1 %v1696_v18 }
  0x30   :  { %550 = vmatpush1.msra.mxu0 %v1805_v20  ;;  %1560 = vmatpush1.msra.mxu1 %v2018_v5  ;;  %v87_v20 = vld [vmem:[%s2810_s1 + $0x60] sm:$0xff] }
  0x31   :  { %1525 = vmatprep.mubr.msk.f32.mxu1 %vm159_vm0, %v119_v6  ;;  %1543 = vmatprep.subr.mxu1 %v1696_v18  ;;  %v25_v6 = vld [vmem:[%s2812_s0] sm:$0xff] }
  0x32   :  { %282 = vmatprep.mubr.f32.mxu0 %v82_v7  ;;  %1526 = vmatmul.mubr.msk.f32.gmra.mxu1 %vm159_vm0, %v122_v8  ;;  %v56_v7 = vld [vmem:[%s2812_s0 + $0xf8] sm:$0xff]  ;;  %v55_v8 = vld [vmem:[%s2812_s0 + $0xf0] sm:$0xff] }
  0x33   :  { %1561 = vmatpush1.msra.mxu1 %v2037_v9  ;;  %283 = vmatmul.mubr.f32.gmra.mxu0 %v81_v10 }
  0x34   :  { %551 = vmatprep.subr.mxu0 %v1696_v18  ;;  %1544 = vmatprep.subr.mxu1 %v1696_v18 }
  0x35   :  { %552 = vmatpush1.msra.mxu0 %v1818_v23  ;;  %1562 = vmatpush2.msra.mxu1 %v2048_v11  ;;  %v32_v23 = vld [vmem:[%s2812_s0 + $0x38] sm:$0xff] }
  0x36   :  { %1545 = vmatprep.subr.mxu1 %v1696_v18  ;;  %287 = vmatprep.mubr.f32.mxu0 %v85_v12 }
  0x37   :  { %553 = vmatprep.subr.mxu0 %v1696_v18  ;;  %1563 = vmatpush2.msra.mxu1 %v2059_v13 }
  0x38   :  { %1364 = vmatprep.mubr.msk.f32.mxu1 %vm498_vm1, %v28_v14  ;;  %288 = vmatmul.mubr.f32.gmra.mxu0 %v84_v15 }
  0x39   :  { %554 = vmatpush1.msra.mxu0 %v1842_v29  ;;  %617 = vmatmul.mubr.f32.vlgmr.msra.gmra.mxu1 %v27_v16  ;;  %v93_v29 = vld [vmem:[%s2810_s1 + $0x90] sm:$0xff] }
  0x3a   :  { %292 = vmatprep.mubr.f32.mxu0 %v88_v17  ;;  %555 = vmatprep.subr.mxu0 %v1696_v18 }
  0x3b   :  { %1365 = vmatprep.mubr.msk.f32.mxu1 %vm498_vm1, %v30_v19  ;;  %556 = vmatpush1.msra.mxu0 %v1855_v32  ;;  %v36_v32 = vld [vmem:[%s2812_s0 + $0x58] sm:$0xff] }
  0x3c   :  { %293 = vmatmul.mubr.f32.gmra.mxu0 %v87_v20  ;;  %557 = vmatprep.subr.mxu0 %v1696_v18 }
  0x3d   :  { %622 = vmatmul.mubr.f32.gmra.mxu1 %v29_v21  ;;  %297 = vmatprep.mubr.f32.mxu0 %v91_v22 }
  0x3e   :  { %558 = vmatpush1.msra.mxu0 %v1876_v37  ;;  %1366 = vmatprep.mubr.msk.f32.mxu1 %vm498_vm1, %v32_v23  ;;  %v99_v37 = vld [vmem:[%s2810_s1 + $0xc0] sm:$0xff] }
  0x3f   :  { %559 = vmatprep.subr.mxu0 %v1696_v18  ;;  %861 = vrot.lane.b32.xlu1 %v828_v24, %s1697_s18 }
  0x40   :  { %298 = vmatmul.mubr.f32.gmra.mxu0 %v90_v25 }
  0x41   :  { %627 = vmatmul.mubr.f32.gmra.mxu1 %v31_v26  ;;  %302 = vmatprep.mubr.f32.mxu0 %v94_v27 }
  0x42   :  { %560 = vmatpush1.msra.mxu0 %v1889_v40  ;;  %1367 = vmatprep.mubr.msk.f32.mxu1 %vm498_vm1, %v34_v28  ;;  %v40_v40 = vld [vmem:[%s2812_s0 + $0x78] sm:$0xff] }
  0x43   :  { %561 = vmatprep.subr.mxu0 %v1696_v18 }
  0x44   :  { %303 = vmatmul.mubr.f32.gmra.mxu0 %v93_v29 }
  0x45   :  { %632 = vmatmul.mubr.f32.gmra.mxu1 %v33_v30  ;;  %562 = vmatpush1.msra.mxu0 %v1910_v45  ;;  %v105_v45 = vld [vmem:[%s2810_s1 + $0xf0] sm:$0xff] }
  0x46   :  { %307 = vmatprep.mubr.f32.mxu0 %v97_v31  ;;  %1368 = vmatprep.mubr.msk.f32.mxu1 %vm498_vm1, %v36_v32 }
  0x47   :  { %563 = vmatprep.subr.mxu0 %v1696_v18 }
  0x48   :  { %308 = vmatmul.mubr.f32.gmra.mxu0 %v96_v33 }
  0x49   :  { %637 = vmatmul.mubr.f32.gmra.mxu1 %v35_v34  ;;  %564 = vmatpush1.msra.mxu0 %v1923_v48  ;;  %v44_v48 = vld [vmem:[%s2812_s0 + $0x98] sm:$0xff] }
  0x4a   :  { %312 = vmatprep.mubr.f32.mxu0 %v100_v35  ;;  %1369 = vmatprep.mubr.msk.f32.mxu1 %vm498_vm1, %v38_v36 }
  0x4b   :  { %565 = vmatprep.subr.mxu0 %v1696_v18 }
  0x4c   :  { %313 = vmatmul.mubr.f32.gmra.mxu0 %v99_v37  ;;  %v2319_v37 = vld [vmem:[%s2814_s4] ss:$0 sm:$0xff]  ;;  %s1698_s4 = smov 64  }
  0x4d   :  { %642 = vmatmul.mubr.f32.gmra.mxu1 %v37_v38  ;;  %566 = vmatpush1.msra.mxu0 %v1944_v53  ;;  %v827_v53 = vld [vmem:[%s2813_s5] sm:$0xff] }
  0x4e   :  { %317 = vmatprep.mubr.f32.mxu0 %v103_v39  ;;  %1370 = vmatprep.mubr.msk.f32.mxu1 %vm498_vm1, %v40_v40 }
  0x4f   :  { %567 = vmatprep.subr.mxu0 %v1696_v18  ;;  %859 = vrot.lane.b32.xlu0 %v827_v53, %s1697_s18 }
  0x50   :  { %318 = vmatmul.mubr.f32.gmra.mxu0 %v102_v41 }
  0x51   :  { %647 = vmatmul.mubr.f32.gmra.mxu1 %v39_v42  ;;  %568 = vmatpush1.msra.mxu0 %v1957_v56  ;;  %v115_v56 = vld [vmem:[%s2810_s1 + $0x140] sm:$0xff] }
  0x52   :  { %322 = vmatprep.mubr.f32.mxu0 %v106_v43  ;;  %1371 = vmatprep.mubr.msk.f32.mxu1 %vm498_vm1, %v42_v44 }
  0x53   :  { %569 = vmatprep.subr.mxu0 %v1696_v18 }
  0x54   :  { %323 = vmatmul.mubr.f32.gmra.mxu0 %v105_v45 }
  0x55   :  { %652 = vmatmul.mubr.f32.gmra.mxu1 %v41_v46  ;;  %570 = vmatpush1.msra.mxu0 %v1978_v61  ;;  %v50_v61 = vld [vmem:[%s2812_s0 + $0xc8] sm:$0xff] }
  0x56   :  { %327 = vmatprep.mubr.f32.mxu0 %v109_v47  ;;  %571 = vmatprep.subr.mxu0 %v1696_v18 }
  0x57   :  { %1372 = vmatprep.mubr.msk.f32.mxu1 %vm498_vm1, %v44_v48  ;;  %572 = vmatpush1.msra.mxu0 %v1988_v63  ;;  %v49_v63 = vld [vmem:[%s2812_s0 + $0xc0] sm:$0xff] }
  0x58   :  { %328 = vmatmul.mubr.f32.gmra.mxu0 %v108_v49  ;;  %573 = vmatprep.subr.mxu0 %v1696_v18 }
  0x59   :  { %657 = vmatmul.mubr.f32.gmra.mxu1 %v43_v50  ;;  %332 = vmatprep.mubr.f32.mxu0 %v112_v51 }
  0x5a   :  { %1373 = vmatprep.mubr.msk.f32.mxu1 %vm498_vm1, %v46_v52  ;;  %574 = vmatpush1.msra.mxu0 %v2007_v3  ;;  %v51_v3 = vld [vmem:[%s2812_s0 + $0xd0] sm:$0xff] }
  0x5b   :  { %575 = vmatprep.subr.mxu0 %v1696_v18 }
  0x5c   :  { %333 = vmatmul.mubr.f32.gmra.mxu0 %v111_v54 }
  0x5d   :  { %662 = vmatmul.mubr.f32.gmra.mxu1 %v45_v55  ;;  %337 = vmatprep.mubr.f32.mxu0 %v115_v56 }
  0x5e   :  { %576 = vmatpush1.msra.mxu0 %v2018_v5  ;;  %1374 = vmatprep.mubr.msk.f32.mxu1 %vm498_vm1, %v48_v57  ;;  %v54_v5 = vld [vmem:[%s2812_s0 + $0xe8] sm:$0xff] }
  0x5f   :  { %577 = vmatprep.subr.mxu0 %v1696_v18 }
  0x60   :  { %338 = vmatmul.mubr.f32.gmra.mxu0 %v114_v58 }
  0x61   :  { %667 = vmatmul.mubr.f32.gmra.mxu1 %v47_v59  ;;  %342 = vmatprep.mubr.f32.mxu0 %v118_v60 }
  0x62   :  { %578 = vmatpush1.msra.mxu0 %v2037_v9  ;;  %1375 = vmatprep.mubr.msk.f32.mxu1 %vm498_vm1, %v50_v61 }
  0x63   :  { %607 = vmatprep.subr.mxu0 %v1696_v18 }
  0x64   :  { %343 = vmatmul.mubr.f32.gmra.mxu0 %v117_v62 }
  0x65   :  { %672 = vmatmul.mubr.f32.gmra.mxu1 %v49_v63  ;;  %608 = vmatpush2.msra.mxu0 %v2048_v11 }
  0x66   :  { %347 = vmatprep.mubr.f32.mxu0 %v121_v0  ;;  %1376 = vmatprep.mubr.msk.f32.mxu1 %vm498_vm1, %v52_v1 }
  0x67   :  { %609 = vmatprep.subr.mxu0 %v1696_v18  ;;  %v53_v18 = vld [vmem:[%s2812_s0 + $0xe0] sm:$0xff] }
  0x68   :  { %348 = vmatmul.mubr.f32.gmra.mxu0 %v120_v2 }
  0x69   :  { %677 = vmatmul.mubr.f32.gmra.mxu1 %v51_v3  ;;  %610 = vmatpush2.msra.mxu0 %v2059_v13 }
  0x6a   :  { %1363 = vmatprep.mubr.msk.f32.mxu0 %vm498_vm1, %v26_v4  ;;  %1377 = vmatprep.mubr.msk.f32.mxu1 %vm498_vm1, %v54_v5 }
  0x6c   :  { %612 = vmatmul.mubr.f32.vlgmr.msra.gmra.mxu0 %v25_v6 }
  0x6d   :  { %682 = vmatmul.mubr.f32.gmra.mxu1 %v53_v18 }
  0x6e   :  { %1378 = vmatprep.mubr.msk.f32.mxu1 %vm498_vm1, %v56_v7 }
  0x71   :  { %687 = vmatmul.mubr.f32.gmra.mxu1 %v55_v8 }
  0xcc   :  { %v1506_v9 = vpop.f32.mrf.mxu1 }
  0xce   :  { %v2290_v10 = vpop.f32.mrf.mxu1 }
  0xd4   :  { %v1509_v11 = vpop.f32.mrf.mxu1 }
  0xd6   :  { %v429_v12 = vpop.f32.mrf.mxu1 }
  0xd9   :  { %v1512_v13 = vpop.f32.mrf.mxu1 }
  0xdb   :  { %v439_v14 = vpop.f32.mrf.mxu1 }
  0xde   :  { %v2292_v15 = vpop.f32.mrf.mxu1 }
  0xe0   :  { %v2294_v16 = vpop.f32.mrf.mxu1 }
  0xe3   :  { %v2296_v17 = vpop.f32.mrf.mxu1 }
  0xe5   :  { %v2298_v19 = vpop.f32.mrf.mxu1 }
  0xe8   :  { %v2300_v20 = vpop.f32.mrf.mxu1 }
  0xe9   :  { %v2302_v21 = vpop.f32.mrf.mxu0 }
  0xea   :  { %v2304_v22 = vpop.f32.mrf.mxu1 }
  0xeb   :  { %v2306_v23 = vpop.f32.mrf.mxu0 }
  0xed   :  { %v2308_v24 = vpop.f32.mrf.mxu1 }
  0xee   :  { %v1431_v25 = vpop.f32.mrf.mxu0 }
  0xef   :  { %v2310_v26 = vpop.f32.mrf.mxu1 }
  0xf0   :  { %v1432_v27 = vpop.f32.mrf.mxu0 }
  0xf1   :  { %v1433_v30 = vadd.f32 %v1432_v27, %v1431_v25 }
  0xf2   :  { %v2312_v28 = vpop.f32.mrf.mxu1 }
  0xf3   :  { %v1434_v29 = vpop.f32.mrf.mxu0  ;;  %v425_v35 = vadd.f32 %v1506_v9, %v1433_v30 }
  0xf4   :  { %v2314_v32 = vpop.f32.mrf.mxu1 }
  0xf5   :  { %v1435_v31 = vpop.f32.mrf.mxu0 }
  0xf6   :  { %v1436_v33 = vadd.f32 %v1435_v31, %v1434_v29 }
  0xf8   :  { %v1437_v34 = vpop.f32.mrf.mxu0  ;;  %v430_v44 = vadd.f32 %v1436_v33, %v429_v12 }
  0xf9   :  { %v618_v36 = vpop.f32.mrf.mxu1 }
  0xfa   :  { %v619_v38 = vadd.f32 %v618_v36, %v425_v35  ;;  %v1438_v39 = vpop.f32.mrf.mxu0 }
  0xfb   :  { %v620_v40 = vpop.f32.mrf.mxu1  ;;  %v1439_v42 = vadd.f32 %v1438_v39, %v1437_v34 }
  0xfc   :  { %v2322_v41 = vadd.f32 %v2319_v37, %v619_v38  ;;  %v1440_v43 = vpop.f32.mrf.mxu0 }
  0xfd   :  { %v623_v45 = vpop.f32.mrf.mxu1  ;;  %v435_v52 = vadd.f32 %v1509_v11, %v1439_v42 }
  0xfe   :  { %1568 = vtanh.f32 %v2322_v41  ;;  %v624_v46 = vadd.f32 %v623_v45, %v430_v44  ;;  %v1441_v47 = vpop.f32.mrf.mxu0 }
  0xff   :  { %v625_v48 = vpop.f32.mrf.mxu1  ;;  %v1442_v50 = vadd.f32 %v1441_v47, %v1440_v43 }
 0x100   :  { %v2326_v49 = vadd.f32 %v2319_v37, %v624_v46  ;;  %v1443_v51 = vpop.f32.mrf.mxu0 }
 0x101   :  { %v628_v53 = vpop.f32.mrf.mxu1  ;;  %v440_v60 = vadd.f32 %v1442_v50, %v439_v14 }
 0x102   :  { %1570 = vtanh.f32 %v2326_v49  ;;  %v629_v54 = vadd.f32 %v628_v53, %v435_v52  ;;  %v1444_v55 = vpop.f32.mrf.mxu0 }
 0x103   :  { %v630_v56 = vpop.f32.mrf.mxu1  ;;  %v1445_v58 = vadd.f32 %v1444_v55, %v1443_v51 }
 0x104   :  { %v2330_v57 = vadd.f32 %v2319_v37, %v629_v54  ;;  %v1446_v59 = vpop.f32.mrf.mxu0 }
 0x105   :  { %v633_v61 = vpop.f32.mrf.mxu1  ;;  %v445_v4 = vadd.f32 %v1512_v13, %v1445_v58 }
 0x106   :  { %1572 = vtanh.f32 %v2330_v57  ;;  %v634_v62 = vadd.f32 %v633_v61, %v440_v60  ;;  %v1447_v63 = vpop.f32.mrf.mxu0 }
 0x107   :  { %v635_v0 = vpop.f32.mrf.mxu1  ;;  %v1448_v2 = vadd.f32 %v1447_v63, %v1446_v59 }
 0x108   :  { %v2334_v1 = vadd.f32 %v2319_v37, %v634_v62  ;;  %v1449_v3 = vpop.f32.mrf.mxu0 }
 0x109   :  { %v638_v5 = vpop.f32.mrf.mxu1  ;;  %v450_v14 = vadd.f32 %v1448_v2, %v2294_v16 }
 0x10a   :  { %1574 = vtanh.f32 %v2334_v1  ;;  %v639_v6 = vadd.f32 %v638_v5, %v445_v4  ;;  %v1450_v18 = vpop.f32.mrf.mxu0 }
 0x10b   :  { %v1569_v7 = vpop.eup %1568  ;;  %v640_v8 = vpop.f32.mrf.mxu1  ;;  %v1451_v11 = vadd.f32 %v1450_v18, %v1449_v3 }
 0x10c   :  { %v2338_v9 = vadd.f32 %v2319_v37, %v639_v6  ;;  %941 = vrot.lane.b32.xlu0 %v1569_v7, %s1698_s4  ;;  %v1452_v12 = vpop.f32.mrf.mxu0 }
 0x10d   :  { %v643_v25 = vpop.f32.mrf.mxu1  ;;  %v455_v35 = vadd.f32 %v2292_v15, %v1451_v11 }
 0x10e   :  { %1576 = vtanh.f32 %v2338_v9  ;;  %v644_v13 = vadd.f32 %v643_v25, %v450_v14  ;;  %v1453_v27 = vpop.f32.mrf.mxu0 }
 0x10f   :  { %v1571_v29 = vpop.eup %1570  ;;  %v645_v30 = vpop.f32.mrf.mxu1  ;;  %v1454_v33 = vadd.f32 %v1453_v27, %v1452_v12 }
 0x110   :  { %v2344_v31 = vadd.f32 %v2319_v37, %v644_v13  ;;  %943 = vrot.lane.b32.xlu1 %v1571_v29, %s1698_s4  ;;  %v1455_v34 = vpop.f32.mrf.mxu0 }
 0x111   :  { %v648_v36 = vpop.f32.mrf.mxu1  ;;  %v460_v45 = vadd.f32 %v1454_v33, %v2298_v19 }
 0x112   :  { %1578 = vtanh.f32 %v2344_v31  ;;  %v649_v16 = vadd.f32 %v648_v36, %v455_v35  ;;  %v1456_v38 = vpop.f32.mrf.mxu0  ;;  %v1430_v35 = vadd.f32 %v2306_v23, %v2302_v21 }
 0x113   :  { %v1573_v39 = vpop.eup %1572  ;;  %v650_v40 = vpop.f32.mrf.mxu1  ;;  %v1457_v43 = vadd.f32 %v1456_v38, %v1455_v34 }
 0x114   :  { %v2350_v42 = vadd.f32 %v2319_v37, %v649_v16  ;;  %945 = vrot.lane.b32.xlu1 %v1573_v39, %s1698_s4  ;;  %v1458_v44 = vpop.f32.mrf.mxu0 }
 0x115   :  { %v653_v46 = vpop.f32.mrf.mxu1  ;;  %v465_v54 = vadd.f32 %v2296_v17, %v1457_v43 }
 0x116   :  { %1580 = vtanh.f32 %v2350_v42  ;;  %v654_v15 = vadd.f32 %v653_v46, %v460_v45  ;;  %v1459_v47 = vpop.f32.mrf.mxu0 }
 0x117   :  { %v1575_v48 = vpop.eup %1574  ;;  %v655_v50 = vpop.f32.mrf.mxu1  ;;  %v1460_v52 = vadd.f32 %v1459_v47, %v1458_v44 }
 0x118   :  { %v2356_v51 = vadd.f32 %v2319_v37, %v654_v15  ;;  %947 = vrot.lane.b32.xlu0 %v1575_v48, %s1698_s4  ;;  %v1461_v53 = vpop.f32.mrf.mxu0  ;;  %v420_v15 = vadd.f32 %v1430_v35, %v2290_v10  ;;  %v1386_v35 = vmul.f32 -1.442695, %v2344_v31 }
 0x119   :  { %v658_v55 = vpop.f32.mrf.mxu1  ;;  %v470_v63 = vadd.f32 %v1460_v52, %v2304_v22 }
 0x11a   :  { %1582 = vtanh.f32 %v2356_v51  ;;  %v659_v19 = vadd.f32 %v658_v55, %v465_v54  ;;  %v1462_v56 = vpop.f32.mrf.mxu0 }
 0x11b   :  { %v1577_v58 = vpop.eup %1576  ;;  %v660_v59 = vpop.f32.mrf.mxu1  ;;  %v1463_v61 = vadd.f32 %v1462_v56, %v1461_v53 }
 0x11c   :  { %v2362_v60 = vadd.f32 %v2319_v37, %v659_v19  ;;  %949 = vrot.lane.b32.xlu1 %v1577_v58, %s1698_s4  ;;  %v1464_v62 = vpop.f32.mrf.mxu0 }
 0x11d   :  { %v663_v0 = vpop.f32.mrf.mxu1  ;;  %v475_v7 = vadd.f32 %v2300_v20, %v1463_v61 }
 0x11e   :  { %1584 = vtanh.f32 %v2362_v60  ;;  %v664_v17 = vadd.f32 %v663_v0, %v470_v63  ;;  %v1465_v2 = vpop.f32.mrf.mxu0 }
 0x11f   :  { %v1579_v3 = vpop.eup %1578  ;;  %v665_v4 = vpop.f32.mrf.mxu1  ;;  %v1466_v6 = vadd.f32 %v1465_v2, %v1464_v62 }
 0x120   :  { %v2368_v5 = vadd.f32 %v2319_v37, %v664_v17  ;;  %951 = vrot.lane.b32.xlu0 %v1579_v3, %s1698_s4  ;;  %v1467_v18 = vpop.f32.mrf.mxu0  ;;  %v830_v3 = vld [vmem:[%s2813_s5 + $0x18] sm:$0xff]  ;;  %v831_v4 = vld [vmem:[%s2813_s5 + $0x20] sm:$0xff] }
 0x121   :  { %v668_v8 = vpop.f32.mrf.mxu1  ;;  %v480_v29 = vadd.f32 %v1466_v6, %v2310_v26  ;;  %v832_v6 = vld [vmem:[%s2813_s5 + $0x28] sm:$0xff] }
 0x122   :  { %1586 = vtanh.f32 %v2368_v5  ;;  %v669_v22 = vadd.f32 %v668_v8, %v475_v7  ;;  %v1468_v11 = vpop.f32.mrf.mxu0  ;;  %v834_v7 = vld [vmem:[%s2813_s5 + $0x38] sm:$0xff]  ;;  %v835_v8 = vld [vmem:[%s2813_s5 + $0x40] sm:$0xff] }
 0x123   :  { %v1581_v12 = vpop.eup %1580  ;;  %v670_v14 = vpop.f32.mrf.mxu1  ;;  %v1469_v13 = vadd.f32 %v1468_v11, %v1467_v18  ;;  %v833_v18 = vld [vmem:[%s2813_s5 + $0x30] sm:$0xff] }
 0x124   :  { %v2374_v25 = vadd.f32 %v2319_v37, %v669_v22  ;;  %953 = vrot.lane.b32.xlu1 %v1581_v12, %s1698_s4  ;;  %v1470_v27 = vpop.f32.mrf.mxu0  ;;  %v836_v22 = vld [vmem:[%s2813_s5 + $0x48] sm:$0xff]  ;;  %v837_v11 = vld [vmem:[%s2813_s5 + $0x50] sm:$0xff]  ;;  %v838_v12 = vld [vmem:[%s2813_s5 + $0x58] sm:$0xff]  ;;  %v1381_v14 = vmul.f32 -1.442695, %v2322_v41 }
 0x125   :  { %v673_v30 = vpop.f32.mrf.mxu1  ;;  %v485_v40 = vadd.f32 %v2308_v24, %v1469_v13  ;;  %v839_v13 = vld [vmem:[%s2813_s5 + $0x60] sm:$0xff]  ;;  %v841_v41 = vld [vmem:[%s2813_s5 + $0x70] sm:$0xff] }
 0x126   :  { %1588 = vtanh.f32 %v2374_v25  ;;  %v674_v20 = vadd.f32 %v673_v30, %v480_v29  ;;  %v1471_v33 = vpop.f32.mrf.mxu0  ;;  %v1382_v29 = vmul.f32 -1.442695, %v2326_v49  ;;  %v842_v30 = vld [vmem:[%s2813_s5 + $0x78] sm:$0xff]  ;;  %v1384_v49 = vmul.f32 -1.442695, %v2334_v1 }
 0x127   :  { %v1583_v34 = vpop.eup %1582  ;;  %v675_v36 = vpop.f32.mrf.mxu1  ;;  %v1472_v38 = vadd.f32 %v1471_v33, %v1470_v27  ;;  %v840_v27 = vld [vmem:[%s2813_s5 + $0x68] sm:$0xff]  ;;  %v1385_v33 = vmul.f32 -1.442695, %v2338_v9  ;;  %v1389_v9 = vmul.f32 -1.442695, %v2362_v60 }
 0x128   :  { %v2382_v16 = vadd.f32 %v2319_v37, %v674_v20  ;;  %955 = vrot.lane.b32.xlu0 %v1583_v34, %s1698_s4  ;;  %v1473_v39 = vpop.f32.mrf.mxu0  ;;  %v1383_v20 = vmul.f32 -1.442695, %v2330_v57 }
 0x129   :  { %v678_v26 = vpop.f32.mrf.mxu1  ;;  %v490_v48 = vadd.f32 %v1472_v38, %v2314_v32 }
 0x12a   :  { %1590 = vtanh.f32 %v2382_v16  ;;  %v679_v43 = vadd.f32 %v678_v26, %v485_v40  ;;  %v1474_v44 = vpop.f32.mrf.mxu0  ;;  %v1388_v26 = vmul.f32 -1.442695, %v2356_v51  ;;  %v2484_v51 = vpop.permute.xlu1 %861 }
 0x12b   :  { %v1585_v45 = vpop.eup %1584  ;;  %v680_v46 = vpop.f32.mrf.mxu1  ;;  %v1475_v23 = vadd.f32 %v1474_v44, %v1473_v39  ;;  %v1387_v39 = vmul.f32 -1.442695, %v2350_v42  ;;  %v1390_v42 = vmul.f32 -1.442695, %v2368_v5 }
 0x12c   :  { %v2389_v21 = vadd.f32 %v2319_v37, %v679_v43  ;;  %957 = vrot.lane.b32.xlu1 %v1585_v45, %s1698_s4  ;;  %v613_v47 = vpop.f32.mrf.mxu0  ;;  %v2479_v45 = vpop.permute.xlu0 %859 }
 0x12d   :  { %v614_v50 = vadd.f32 %v613_v47, %v420_v15  ;;  %v683_v24 = vpop.f32.mrf.mxu1  ;;  %v495_v19 = vadd.f32 %v2312_v28, %v1475_v23 }
 0x12e   :  { %1592 = vtanh.f32 %v2389_v21  ;;  %v684_v52 = vadd.f32 %v683_v24, %v490_v48  ;;  %v615_v53 = vpop.f32.mrf.mxu0  ;;  %v1391_v24 = vmul.f32 -1.442695, %v2374_v25 }
 0x12f   :  { %v1587_v54 = vpop.eup %1586  ;;  %v2395_v55 = vadd.f32 %v2319_v37, %v614_v50  ;;  %v685_v10 = vpop.f32.mrf.mxu1 }
 0x130   :  { %959 = vrot.lane.b32.xlu0 %v1587_v54, %s1698_s4  ;;  %v2401_v32 = vadd.f32 %v2319_v37, %v684_v52 }
 0x131   :  { %v688_v56 = vpop.f32.mrf.mxu1  ;;  %1594 = vtanh.f32 %v2395_v55 }
 0x132   :  { %v689_v58 = vadd.f32 %v688_v56, %v495_v19  ;;  %1596 = vtanh.f32 %v2401_v32  ;;  %v1392_v19 = vmul.f32 -1.442695, %v2382_v16 }
 0x133   :  { %v1589_v59 = vpop.eup %1588  ;;  %v690_v61 = vpop.f32.mrf.mxu1 }
 0x134   :  { %v2404_v62 = vadd.f32 %v2319_v37, %v689_v58  ;;  %961 = vrot.lane.b32.xlu1 %v1589_v59, %s1698_s4  ;;  %v829_v37 = vld [vmem:[%s2813_s5 + $0x10] sm:$0xff]  ;;  %s1699_s5 = smov 96  }
 0x136   :  { %1598 = vtanh.f32 %v2404_v62 }
 0x137   :  { %v1591_v63 = vpop.eup %1590  ;;  %1600 = vpow2.f32 %v1381_v14 }
 0x138   :  { %963 = vrot.lane.b32.xlu0 %v1591_v63, %s1698_s4  ;;  %1602 = vpow2.f32 %v1382_v29  ;;  %v1393_v63 = vmul.f32 -1.442695, %v2389_v21 }
 0x139   :  { %1604 = vpow2.f32 %v1383_v20 }
 0x13a   :  { %1606 = vpow2.f32 %v1384_v49 }
 0x13b   :  { %v1593_v28 = vpop.eup %1592  ;;  %1608 = vpow2.f32 %v1385_v33 }
 0x13c   :  { %965 = vrot.lane.b32.xlu1 %v1593_v28, %s1698_s4  ;;  %1610 = vpow2.f32 %v1386_v35 }
 0x13e   :  { %v1595_v0 = vpop.eup %1594 }
 0x13f   :  { %939 = vrot.lane.b32.xlu0 %v1595_v0, %s1698_s4  ;;  %v1597_v17 = vpop.eup %1596 }
 0x143   :  { %v1599_v2 = vpop.eup %1598  ;;  %967 = vrot.lane.b32.xlu0 %v1597_v17, %s1698_s4 }
 0x144   :  { %969 = vrot.lane.b32.xlu1 %v1599_v2, %s1698_s4  ;;  %v1601_v34 = vpop.eup %1600 }
 0x145   :  { %v764_v36 = vadd.f32 1.0, %v1601_v34  ;;  %v1603_v38 = vpop.eup %1602 }
 0x146   :  { %v765_v40 = vadd.f32 1.0, %v1603_v38  ;;  %v1605_v57 = vpop.eup %1604 }
 0x147   :  { %863 = vrot.lane.b32.xlu0 %v829_v37, %s1697_s18  ;;  %1612 = vrcp.f32 %v764_v36  ;;  %v766_v1 = vadd.f32 1.0, %v1605_v57  ;;  %v1607_v43 = vpop.eup %1606  ;;  %v1380_v37 = vmul.f32 -1.442695, %v2395_v55 }
 0x148   :  { %865 = vrot.lane.b32.xlu1 %v830_v3, %s1697_s18  ;;  %1614 = vpow2.f32 %v1387_v39  ;;  %v767_v31 = vadd.f32 1.0, %v1607_v43  ;;  %v1609_v44 = vpop.eup %1608 }
 0x149   :  { %1616 = vrcp.f32 %v765_v40  ;;  %v1611_v46 = vpop.eup %1610  ;;  %v768_v15 = vadd.f32 1.0, %v1609_v44 }
 0x14a   :  { %1618 = vpow2.f32 %v1388_v26  ;;  %v769_v50 = vadd.f32 1.0, %v1611_v46 }
 0x14b   :  { %867 = vrot.lane.b32.xlu0 %v831_v4, %s1697_s18  ;;  %1620 = vrcp.f32 %v766_v1 }
 0x14c   :  { %869 = vrot.lane.b32.xlu1 %v832_v6, %s1697_s18  ;;  %1622 = vpow2.f32 %v1389_v9 }
 0x14d   :  { %1624 = vrcp.f32 %v767_v31 }
 0x14e   :  { %1626 = vpow2.f32 %v1390_v42 }
 0x14f   :  { %871 = vrot.lane.b32.xlu0 %v833_v18, %s1697_s18  ;;  %1628 = vrcp.f32 %v768_v15 }
 0x150   :  { %873 = vrot.lane.b32.xlu1 %v834_v7, %s1697_s18  ;;  %1630 = vrcp.f32 %v769_v50  ;;  %v1394_v7 = vmul.f32 -1.442695, %v2401_v32 }
 0x151   :  { %1632 = vpow2.f32 %v1391_v24 }
 0x153   :  { %875 = vrot.lane.b32.xlu0 %v835_v8, %s1697_s18 }
 0x154   :  { %877 = vrot.lane.b32.xlu1 %v836_v22, %s1697_s18  ;;  %v2482_v23 = vpop.eup %1612  ;;  %v1395_v22 = vmul.f32 -1.442695, %v2404_v62 }
 0x155   :  { %v1615_v60 = vpop.eup %1614 }
 0x156   :  { %v2489_v52 = vpop.eup %1616  ;;  %v770_v54 = vadd.f32 1.0, %v1615_v60 }
 0x157   :  { %879 = vrot.lane.b32.xlu0 %v837_v11, %s1697_s18  ;;  %v1619_v10 = vpop.eup %1618 }
 0x158   :  { %881 = vrot.lane.b32.xlu1 %v838_v12, %s1697_s18  ;;  %v2494_v56 = vpop.eup %1620  ;;  %1634 = vrcp.f32 %v770_v54  ;;  %v771_v59 = vadd.f32 1.0, %v1619_v10 }
 0x159   :  { %v1623_v61 = vpop.eup %1622  ;;  %1636 = vpow2.f32 %v1392_v19 }
 0x15a   :  { %v2499_v28 = vpop.eup %1624  ;;  %1638 = vrcp.f32 %v771_v59  ;;  %v772_v17 = vadd.f32 1.0, %v1623_v61 }
 0x15b   :  { %883 = vrot.lane.b32.xlu0 %v839_v13, %s1697_s18  ;;  %v1627_v2 = vpop.eup %1626  ;;  %1640 = vpow2.f32 %v1393_v63 }
 0x15c   :  { %885 = vrot.lane.b32.xlu1 %v840_v27, %s1697_s18  ;;  %v2504_v3 = vpop.eup %1628  ;;  %1642 = vrcp.f32 %v772_v17  ;;  %v773_v6 = vadd.f32 1.0, %v1627_v2 }
 0x15d   :  { %v2507_v18 = vpop.eup %1630  ;;  %1644 = vpow2.f32 %v1380_v37 }
 0x15e   :  { %v1633_v8 = vpop.eup %1632  ;;  %1646 = vrcp.f32 %v773_v6 }
 0x15f   :  { %887 = vrot.lane.b32.xlu0 %v841_v41, %s1697_s18  ;;  %v774_v14 = vadd.f32 1.0, %v1633_v8  ;;  %1648 = vpow2.f32 %v1394_v7 }
 0x160   :  { %889 = vrot.lane.b32.xlu1 %v842_v30, %s1697_s18  ;;  %1650 = vpow2.f32 %v1395_v22 }
 0x161   :  { %1652 = vrcp.f32 %v774_v14 }
 0x165   :  { %v2513_v12 = vpop.eup %1634 }
 0x166   :  { %v1637_v13 = vpop.eup %1636 }
 0x167   :  { %v2517_v29 = vpop.eup %1638  ;;  %v775_v41 = vadd.f32 1.0, %v1637_v13 }
 0x168   :  { %v1641_v62 = vpop.eup %1640 }
 0x169   :  { %v2521_v49 = vpop.eup %1642  ;;  %1654 = vrcp.f32 %v775_v41  ;;  %v776_v33 = vadd.f32 1.0, %v1641_v62 }
 0x16a   :  { %v1645_v34 = vpop.eup %1644 }
 0x16b   :  { %v2525_v38 = vpop.eup %1646  ;;  %1656 = vrcp.f32 %v776_v33  ;;  %v763_v39 = vadd.f32 1.0, %v1645_v34 }
 0x16c   :  { %v1649_v40 = vpop.eup %1648 }
 0x16d   :  { %v1651_v26 = vpop.eup %1650  ;;  %1658 = vrcp.f32 %v763_v39  ;;  %v777_v43 = vadd.f32 1.0, %v1649_v40 }
 0x16e   :  { %v2530_v9 = vpop.eup %1652  ;;  %v778_v31 = vadd.f32 1.0, %v1651_v26 }
 0x16f   :  { %1660 = vrcp.f32 %v777_v43 }
 0x170   :  { %1662 = vrcp.f32 %v778_v31 }
 0x176   :  { %v2534_v46 = vpop.eup %1654 }
 0x17e   :  { %v942_v47 = vpop.permute.xlu0 %941 }
 0x17f   :  { %v988_v48 = vmul.f32 %v2482_v23, %v942_v47 }
 0x181   :  { %1021 = vrot.lane.b32.xlu1 %v988_v48, %s1697_s18  ;;  %v2538_v48 = vpop.eup %1656 }
 0x182   :  { %v944_v5 = vpop.permute.xlu1 %943  ;;  %v2542_v24 = vpop.eup %1658 }
 0x183   :  { %v989_v53 = vmul.f32 %v2489_v52, %v944_v5  ;;  %v2546_v54 = vpop.eup %1660 }
 0x184   :  { %v2548_v19 = vpop.eup %1662 }
 0x185   :  { %1023 = vrot.lane.b32.xlu0 %v989_v53, %s1697_s18 }
 0x186   :  { %v946_v58 = vpop.permute.xlu1 %945 }
 0x187   :  { %v990_v25 = vmul.f32 %v2494_v56, %v946_v58 }
 0x189   :  { %1025 = vrot.lane.b32.xlu1 %v990_v25, %s1697_s18 }
 0x18a   :  { %v948_v0 = vpop.permute.xlu0 %947 }
 0x18b   :  { %v991_v16 = vmul.f32 %v2499_v28, %v948_v0 }
 0x18d   :  { %1027 = vrot.lane.b32.xlu0 %v991_v16, %s1697_s18 }
 0x18e   :  { %v950_v4 = vpop.permute.xlu1 %949 }
 0x18f   :  { %v992_v21 = vmul.f32 %v2504_v3, %v950_v4 }
 0x191   :  { %1029 = vrot.lane.b32.xlu1 %v992_v21, %s1697_s18 }
 0x192   :  { %v952_v55 = vpop.permute.xlu0 %951 }
 0x193   :  { %v993_v11 = vmul.f32 %v2507_v18, %v952_v55  ;;  %v908_v55 = vmul.f32 %v2482_v23, %v2484_v51 }
 0x195   :  { %1031 = vrot.lane.b32.xlu0 %v993_v11, %s1697_s18 }
 0x196   :  { %v954_v27 = vpop.permute.xlu1 %953 }
 0x197   :  { %v994_v32 = vmul.f32 %v2513_v12, %v954_v27 }
 0x199   :  { %1033 = vrot.lane.b32.xlu1 %v994_v32, %s1697_s18 }
 0x19a   :  { %v956_v30 = vpop.permute.xlu0 %955 }
 0x19b   :  { %v995_v20 = vmul.f32 %v2517_v29, %v956_v30 }
 0x19d   :  { %1035 = vrot.lane.b32.xlu0 %v995_v20, %s1697_s18 }
 0x19e   :  { %v958_v35 = vpop.permute.xlu1 %957 }
 0x19f   :  { %v996_v36 = vmul.f32 %v2521_v49, %v958_v35 }
 0x1a1   :  { %1037 = vrot.lane.b32.xlu1 %v996_v36, %s1697_s18 }
 0x1a2   :  { %v960_v57 = vpop.permute.xlu0 %959 }
 0x1a3   :  { %v997_v1 = vmul.f32 %v2525_v38, %v960_v57 }
 0x1a5   :  { %1039 = vrot.lane.b32.xlu0 %v997_v1, %s1697_s18 }
 0x1a6   :  { %v962_v44 = vpop.permute.xlu1 %961 }
 0x1a7   :  { %v998_v42 = vmul.f32 %v2530_v9, %v962_v44 }
 0x1a9   :  { %1041 = vrot.lane.b32.xlu1 %v998_v42, %s1697_s18 }
 0x1aa   :  { %v964_v15 = vpop.permute.xlu0 %963 }
 0x1ab   :  { %v999_v47 = vmul.f32 %v2534_v46, %v964_v15 }
 0x1ad   :  { %1043 = vrot.lane.b32.xlu0 %v999_v47, %s1697_s18 }
 0x1ae   :  { %v966_v50 = vpop.permute.xlu1 %965 }
 0x1af   :  { %v1000_v60 = vmul.f32 %v2538_v48, %v966_v50 }
 0x1b1   :  { %1045 = vrot.lane.b32.xlu1 %v1000_v60, %s1697_s18  ;;  %v940_v5 = vpop.permute.xlu0 %939 }
 0x1b2   :  { %v987_v53 = vmul.f32 %v2542_v24, %v940_v5 }
 0x1b4   :  { %1019 = vrot.lane.b32.xlu0 %v987_v53, %s1697_s18 }
 0x1b5   :  { %v968_v10 = vpop.permute.xlu0 %967 }
 0x1b6   :  { %v970_v58 = vpop.permute.xlu1 %969  ;;  %v1001_v25 = vmul.f32 %v2546_v54, %v968_v10 }
 0x1b7   :  { %v1002_v59 = vmul.f32 %v2548_v19, %v970_v58 }
 0x1b8   :  { %1047 = vrot.lane.b32.xlu0 %v1001_v25, %s1697_s18 }
 0x1b9   :  { %1049 = vrot.lane.b32.xlu1 %v1002_v59, %s1697_s18  ;;  %v864_v63 = vpop.permute.xlu0 %863 }
 0x1ba   :  { %v866_v61 = vpop.permute.xlu1 %865  ;;  %v909_v27 = vmul.f32 %v2489_v52, %v864_v63 }
 0x1bb   :  { %v910_v62 = vmul.f32 %v2494_v56, %v866_v61 }
 0x1bd   :  { %v868_v16 = vpop.permute.xlu0 %867 }
 0x1be   :  { %v870_v0 = vpop.permute.xlu1 %869  ;;  %v911_v51 = vmul.f32 %v2499_v28, %v868_v16 }
 0x1bf   :  { %v912_v35 = vmul.f32 %v2504_v3, %v870_v0 }
 0x1c1   :  { %v872_v2 = vpop.permute.xlu0 %871 }
 0x1c2   :  { %v874_v17 = vpop.permute.xlu1 %873  ;;  %v913_v57 = vmul.f32 %v2507_v18, %v872_v2 }
 0x1c3   :  { %v914_v31 = vmul.f32 %v2513_v12, %v874_v17 }
 0x1c5   :  { %v876_v4 = vpop.permute.xlu0 %875 }
 0x1c6   :  { %v878_v37 = vpop.permute.xlu1 %877  ;;  %v915_v47 = vmul.f32 %v2517_v29, %v876_v4 }
 0x1c7   :  { %v916_v53 = vmul.f32 %v2521_v49, %v878_v37 }
 0x1c9   :  { %v880_v6 = vpop.permute.xlu0 %879 }
 0x1ca   :  { %v882_v21 = vpop.permute.xlu1 %881  ;;  %v917_v59 = vmul.f32 %v2525_v38, %v880_v6 }
 0x1cb   :  { %v918_v16 = vmul.f32 %v2530_v9, %v882_v21 }
 0x1cd   :  { %v884_v8 = vpop.permute.xlu0 %883 }
 0x1ce   :  { %v2554_v7 = vpop.permute.xlu1 %885  ;;  %v919_v4 = vmul.f32 %v2534_v46, %v884_v8 }
 0x1d1   :  { %v2560_v11 = vpop.permute.xlu0 %887 }
 0x1d2   :  { %v2556_v22 = vpop.permute.xlu1 %889 }
 0x1f3   :  { %v1022_v14 = vpop.permute.xlu1 %1021 }
 0x1f4   :  { %v1068_v13 = vadd.f32 %v1022_v14, %v908_v55 }
 0x1f6   :  { %1664 = vtanh.f32 %v1068_v13  ;;  %1277 = vrot.lane.b32.xlu1 %v1068_v13, %s1699_s5  ;;  %v920_v13 = vmul.f32 %v2538_v48, %v2554_v7 }
 0x1f7   :  { %v1024_v32 = vpop.permute.xlu0 %1023 }
 0x1f8   :  { %v2564_v41 = vadd.f32 %v1024_v32, %v909_v27 }
 0x1fa   :  { %1666 = vtanh.f32 %v2564_v41 }
 0x1fb   :  { %v1026_v30 = vpop.permute.xlu1 %1025 }
 0x1fc   :  { %v2568_v20 = vadd.f32 %v1026_v30, %v910_v62  ;;  %v907_v62 = vmul.f32 %v2542_v24, %v2479_v45 }
 0x1fe   :  { %1668 = vtanh.f32 %v2568_v20 }
 0x1ff   :  { %v1028_v33 = vpop.permute.xlu0 %1027 }
 0x200   :  { %v2572_v34 = vadd.f32 %v1028_v33, %v911_v51  ;;  %v921_v33 = vmul.f32 %v2546_v54, %v2560_v11 }
 0x202   :  { %1670 = vtanh.f32 %v2572_v34 }
 0x203   :  { %v1665_v36 = vpop.eup %1664  ;;  %v1030_v39 = vpop.permute.xlu1 %1029 }
 0x204   :  { %v2576_v40 = vadd.f32 %v1030_v39, %v912_v35  ;;  %1117 = vrot.lane.b32.xlu1 %v1665_v36, %s1698_s4  ;;  %v922_v35 = vmul.f32 %v2548_v19, %v2556_v22 }
 0x206   :  { %1672 = vtanh.f32 %v2576_v40 }
 0x207   :  { %v1667_v26 = vpop.eup %1666  ;;  %v1032_v1 = vpop.permute.xlu0 %1031 }
 0x208   :  { %v2581_v43 = vadd.f32 %v1032_v1, %v913_v57  ;;  %1119 = vrot.lane.b32.xlu0 %v1667_v26, %s1698_s4 }
 0x20a   :  { %1674 = vtanh.f32 %v2581_v43 }
 0x20b   :  { %v1669_v44 = vpop.eup %1668  ;;  %v1034_v42 = vpop.permute.xlu1 %1033 }
 0x20c   :  { %v2586_v15 = vadd.f32 %v1034_v42, %v914_v31  ;;  %1121 = vrot.lane.b32.xlu1 %v1669_v44, %s1698_s4 }
 0x20e   :  { %1676 = vtanh.f32 %v2586_v15 }
 0x20f   :  { %v1671_v50 = vpop.eup %1670  ;;  %v1036_v60 = vpop.permute.xlu0 %1035 }
 0x210   :  { %v2591_v5 = vadd.f32 %v1036_v60, %v915_v47  ;;  %1123 = vrot.lane.b32.xlu0 %v1671_v50, %s1698_s4 }
 0x212   :  { %1678 = vtanh.f32 %v2591_v5 }
 0x213   :  { %v1673_v10 = vpop.eup %1672  ;;  %v1038_v58 = vpop.permute.xlu1 %1037 }
 0x214   :  { %v1076_v25 = vadd.f32 %v1038_v58, %v916_v53  ;;  %1125 = vrot.lane.b32.xlu1 %v1673_v10, %s1698_s4 }
 0x216   :  { %1680 = vtanh.f32 %v1076_v25 }
 0x217   :  { %v1675_v61 = vpop.eup %1674  ;;  %v1040_v63 = vpop.permute.xlu0 %1039 }
 0x218   :  { %v1077_v0 = vadd.f32 %v1040_v63, %v917_v59  ;;  %1127 = vrot.lane.b32.xlu0 %v1675_v61, %s1698_s4 }
 0x21a   :  { %1682 = vtanh.f32 %v1077_v0 }
 0x21b   :  { %v1677_v17 = vpop.eup %1676  ;;  %v1042_v2 = vpop.permute.xlu1 %1041 }
 0x21c   :  { %v1078_v37 = vadd.f32 %v1042_v2, %v918_v16  ;;  %1129 = vrot.lane.b32.xlu1 %v1677_v17, %s1698_s4 }
 0x21e   :  { %1684 = vtanh.f32 %v1078_v37 }
 0x21f   :  { %v1679_v55 = vpop.eup %1678  ;;  %v1044_v14 = vpop.permute.xlu0 %1043 }
 0x220   :  { %v1079_v6 = vadd.f32 %v1044_v14, %v919_v4  ;;  %1131 = vrot.lane.b32.xlu0 %v1679_v55, %s1698_s4 }
 0x222   :  { %1686 = vtanh.f32 %v1079_v6 }
 0x223   :  { %v1681_v27 = vpop.eup %1680  ;;  %v1046_v21 = vpop.permute.xlu1 %1045 }
 0x224   :  { %v1080_v32 = vadd.f32 %v1046_v21, %v920_v13  ;;  %1133 = vrot.lane.b32.xlu1 %v1681_v27, %s1698_s4 }
 0x226   :  { %1688 = vtanh.f32 %v1080_v32  ;;  %v1020_v30 = vpop.permute.xlu0 %1019 }
 0x227   :  { %v1683_v8 = vpop.eup %1682  ;;  %v1067_v51 = vadd.f32 %v1020_v30, %v907_v62 }
 0x228   :  { %1135 = vrot.lane.b32.xlu0 %v1683_v8, %s1698_s4 }
 0x229   :  { %1690 = vtanh.f32 %v1067_v51 }
 0x22a   :  { %v1048_v36 = vpop.permute.xlu0 %1047 }
 0x22b   :  { %v1685_v7 = vpop.eup %1684  ;;  %v1050_v39 = vpop.permute.xlu1 %1049  ;;  %v2613_v57 = vadd.f32 %v1048_v36, %v921_v33 }
 0x22c   :  { %1137 = vrot.lane.b32.xlu1 %v1685_v7, %s1698_s4  ;;  %1275 = vrot.lane.b32.xlu0 %v1067_v51, %s1699_s5  ;;  %v2617_v45 = vadd.f32 %v1050_v39, %v922_v35 }
 0x22d   :  { %1692 = vtanh.f32 %v2613_v57 }
 0x22e   :  { %1694 = vtanh.f32 %v2617_v45 }
 0x22f   :  { %v1687_v26 = vpop.eup %1686 }
 0x230   :  { %1139 = vrot.lane.b32.xlu0 %v1687_v26, %s1698_s4 }
 0x233   :  { %v1689_v11 = vpop.eup %1688 }
 0x234   :  { %1141 = vrot.lane.b32.xlu1 %v1689_v11, %s1698_s4 }
 0x236   :  { %v1691_v22 = vpop.eup %1690 }
 0x237   :  { %1115 = vrot.lane.b32.xlu0 %v1691_v22, %s1698_s4 }
 0x23a   :  { %v1693_v1 = vpop.eup %1692 }
 0x23b   :  { %v1695_v31 = vpop.eup %1694  ;;  %1143 = vrot.lane.b32.xlu0 %v1693_v1, %s1698_s4 }
 0x23c   :  { %1145 = vrot.lane.b32.xlu1 %v1695_v31, %s1698_s4 }
 0x23f   :  { %1279 = vrot.lane.b32.xlu0 %v2564_v41, %s1699_s5 }
 0x240   :  { %1281 = vrot.lane.b32.xlu1 %v2568_v20, %s1699_s5 }
 0x243   :  { %1283 = vrot.lane.b32.xlu0 %v2572_v34, %s1699_s5 }
 0x244   :  { %1285 = vrot.lane.b32.xlu1 %v2576_v40, %s1699_s5 }
 0x247   :  { %1287 = vrot.lane.b32.xlu0 %v2581_v43, %s1699_s5 }
 0x248   :  { %1289 = vrot.lane.b32.xlu1 %v2586_v15, %s1699_s5 }
 0x24b   :  { %1291 = vrot.lane.b32.xlu0 %v2591_v5, %s1699_s5 }
 0x24c   :  { %1293 = vrot.lane.b32.xlu1 %v1076_v25, %s1699_s5 }
 0x24f   :  { %1295 = vrot.lane.b32.xlu0 %v1077_v0, %s1699_s5 }
 0x250   :  { %1297 = vrot.lane.b32.xlu1 %v1078_v37, %s1699_s5 }
 0x253   :  { %1299 = vrot.lane.b32.xlu0 %v1079_v6, %s1699_s5 }
 0x254   :  { %1301 = vrot.lane.b32.xlu1 %v1080_v32, %s1699_s5 }
 0x268   :  { %v1278_v41 = vpop.permute.xlu1 %1277 }
 0x269   :  { %1324 = vst.msk [vmem:[%s2815_s7 + $0x8] sm:$0xff] %vm159_vm0, %v1278_v41 }
 0x276   :  { %v1118_v20 = vpop.permute.xlu1 %1117 }
 0x277   :  { %v1164_v34 = vmul.f32 %v2482_v23, %v1118_v20 }
 0x279   :  { %1197 = vrot.lane.b32.xlu1 %v1164_v34, %s1697_s18 }
 0x27a   :  { %v1120_v40 = vpop.permute.xlu0 %1119 }
 0x27b   :  { %v1165_v43 = vmul.f32 %v2489_v52, %v1120_v40 }
 0x27d   :  { %1199 = vrot.lane.b32.xlu0 %v1165_v43, %s1697_s18 }
 0x27e   :  { %v1122_v44 = vpop.permute.xlu1 %1121 }
 0x27f   :  { %v1166_v42 = vmul.f32 %v2494_v56, %v1122_v44 }
 0x281   :  { %1201 = vrot.lane.b32.xlu1 %v1166_v42, %s1697_s18 }
 0x282   :  { %v1124_v15 = vpop.permute.xlu0 %1123 }
 0x283   :  { %v1167_v47 = vmul.f32 %v2499_v28, %v1124_v15 }
 0x285   :  { %1203 = vrot.lane.b32.xlu0 %v1167_v47, %s1697_s18 }
 0x286   :  { %v1126_v50 = vpop.permute.xlu1 %1125 }
 0x287   :  { %v1168_v23 = vmul.f32 %v2504_v3, %v1126_v50 }
 0x289   :  { %1205 = vrot.lane.b32.xlu1 %v1168_v23, %s1697_s18 }
 0x28a   :  { %v1128_v60 = vpop.permute.xlu0 %1127 }
 0x28b   :  { %v1169_v52 = vmul.f32 %v2507_v18, %v1128_v60 }
 0x28d   :  { %1207 = vrot.lane.b32.xlu0 %v1169_v52, %s1697_s18 }
 0x28e   :  { %v1130_v5 = vpop.permute.xlu1 %1129 }
 0x28f   :  { %v1170_v56 = vmul.f32 %v2513_v12, %v1130_v5 }
 0x291   :  { %1209 = vrot.lane.b32.xlu1 %v1170_v56, %s1697_s18 }
 0x292   :  { %v1132_v53 = vpop.permute.xlu0 %1131 }
 0x293   :  { %v1171_v28 = vmul.f32 %v2517_v29, %v1132_v53 }
 0x295   :  { %1211 = vrot.lane.b32.xlu0 %v1171_v28, %s1697_s18 }
 0x296   :  { %v1134_v10 = vpop.permute.xlu1 %1133 }
 0x297   :  { %v1172_v3 = vmul.f32 %v2521_v49, %v1134_v10 }
 0x299   :  { %1213 = vrot.lane.b32.xlu1 %v1172_v3, %s1697_s18 }
 0x29a   :  { %v1136_v58 = vpop.permute.xlu0 %1135 }
 0x29b   :  { %v1173_v18 = vmul.f32 %v2525_v38, %v1136_v58 }
 0x29d   :  { %1215 = vrot.lane.b32.xlu0 %v1173_v18, %s1697_s18 }
 0x29e   :  { %v1138_v25 = vpop.permute.xlu1 %1137  ;;  %v1276_v59 = vpop.permute.xlu0 %1275 }
 0x29f   :  { %v1174_v12 = vmul.f32 %v2530_v9, %v1138_v25  ;;  %1323 = vst.msk [vmem:[%s2815_s7] sm:$0xff] %vm159_vm0, %v1276_v59 }
 0x2a1   :  { %1217 = vrot.lane.b32.xlu1 %v1174_v12, %s1697_s18 }
 0x2a2   :  { %v1140_v29 = vpop.permute.xlu0 %1139 }
 0x2a3   :  { %v1175_v49 = vmul.f32 %v2534_v46, %v1140_v29 }
 0x2a5   :  { %1219 = vrot.lane.b32.xlu0 %v1175_v49, %s1697_s18 }
 0x2a6   :  { %v1142_v61 = vpop.permute.xlu1 %1141 }
 0x2a7   :  { %v1176_v38 = vmul.f32 %v2538_v48, %v1142_v61 }
 0x2a9   :  { %1221 = vrot.lane.b32.xlu1 %v1176_v38, %s1697_s18  ;;  %v1116_v63 = vpop.permute.xlu0 %1115 }
 0x2aa   :  { %v1163_v9 = vmul.f32 %v2542_v24, %v1116_v63 }
 0x2ac   :  { %1195 = vrot.lane.b32.xlu0 %v1163_v9, %s1697_s18 }
 0x2ad   :  { %v1144_v0 = vpop.permute.xlu0 %1143 }
 0x2ae   :  { %v1146_v16 = vpop.permute.xlu1 %1145  ;;  %v1177_v17 = vmul.f32 %v2546_v54, %v1144_v0 }
 0x2af   :  { %v1178_v2 = vmul.f32 %v2548_v19, %v1146_v16 }
 0x2b0   :  { %1223 = vrot.lane.b32.xlu0 %v1177_v17, %s1697_s18 }
 0x2b1   :  { %1225 = vrot.lane.b32.xlu1 %v1178_v2, %s1697_s18  ;;  %v1280_v46 = vpop.permute.xlu0 %1279 }
 0x2b2   :  { %v1282_v37 = vpop.permute.xlu1 %1281  ;;  %1325 = vst.msk [vmem:[%s2815_s7 + $0x10] sm:$0xff] %vm159_vm0, %v1280_v46 }
 0x2b3   :  { %1326 = vst.msk [vmem:[%s2815_s7 + $0x18] sm:$0xff] %vm159_vm0, %v1282_v37 }
 0x2b4   :  { %1303 = vrot.lane.b32.xlu0 %v2613_v57, %s1699_s5 }
 0x2b5   :  { %1305 = vrot.lane.b32.xlu1 %v2617_v45, %s1699_s5  ;;  %v1284_v48 = vpop.permute.xlu0 %1283 }
 0x2b6   :  { %v1286_v24 = vpop.permute.xlu1 %1285  ;;  %1327 = vst.msk [vmem:[%s2815_s7 + $0x20] sm:$0xff] %vm159_vm0, %v1284_v48 }
 0x2b7   :  { %1328 = vst.msk [vmem:[%s2815_s7 + $0x28] sm:$0xff] %vm159_vm0, %v1286_v24 }
 0x2b9   :  { %v1288_v54 = vpop.permute.xlu0 %1287 }
 0x2ba   :  { %v1290_v19 = vpop.permute.xlu1 %1289  ;;  %1329 = vst.msk [vmem:[%s2815_s7 + $0x30] sm:$0xff] %vm159_vm0, %v1288_v54 }
 0x2bb   :  { %1330 = vst.msk [vmem:[%s2815_s7 + $0x38] sm:$0xff] %vm159_vm0, %v1290_v19 }
 0x2bd   :  { %v1292_v4 = vpop.permute.xlu0 %1291 }
 0x2be   :  { %v1294_v55 = vpop.permute.xlu1 %1293  ;;  %1331 = vst.msk [vmem:[%s2815_s7 + $0x40] sm:$0xff] %vm159_vm0, %v1292_v4 }
 0x2bf   :  { %1332 = vst.msk [vmem:[%s2815_s7 + $0x48] sm:$0xff] %vm159_vm0, %v1294_v55 }
 0x2c1   :  { %v1296_v14 = vpop.permute.xlu0 %1295 }
 0x2c2   :  { %v1298_v6 = vpop.permute.xlu1 %1297  ;;  %1333 = vst.msk [vmem:[%s2815_s7 + $0x50] sm:$0xff] %vm159_vm0, %v1296_v14 }
 0x2c3   :  { %1334 = vst.msk [vmem:[%s2815_s7 + $0x58] sm:$0xff] %vm159_vm0, %v1298_v6 }
 0x2c5   :  { %v1300_v13 = vpop.permute.xlu0 %1299 }
 0x2c6   :  { %v1302_v27 = vpop.permute.xlu1 %1301  ;;  %1335 = vst.msk [vmem:[%s2815_s7 + $0x60] sm:$0xff] %vm159_vm0, %v1300_v13 }
 0x2c7   :  { %1336 = vst.msk [vmem:[%s2815_s7 + $0x68] sm:$0xff] %vm159_vm0, %v1302_v27 }
 0x2eb   :  { %v1198_v21 = vpop.permute.xlu1 %1197 }
 0x2ec   :  { %1244 = vst.msk [vmem:[%s2816_s6 + $0x8] sm:$0xff] %vm159_vm0, %v1198_v21 }
 0x2ef   :  { %v1200_v32 = vpop.permute.xlu0 %1199 }
 0x2f0   :  { %1245 = vst.msk [vmem:[%s2816_s6 + $0x10] sm:$0xff] %vm159_vm0, %v1200_v32 }
 0x2f3   :  { %v1202_v62 = vpop.permute.xlu1 %1201 }
 0x2f4   :  { %1246 = vst.msk [vmem:[%s2816_s6 + $0x18] sm:$0xff] %vm159_vm0, %v1202_v62 }
 0x2f7   :  { %v1204_v8 = vpop.permute.xlu0 %1203 }
 0x2f8   :  { %1247 = vst.msk [vmem:[%s2816_s6 + $0x20] sm:$0xff] %vm159_vm0, %v1204_v8 }
 0x2fb   :  { %v1206_v30 = vpop.permute.xlu1 %1205 }
 0x2fc   :  { %1248 = vst.msk [vmem:[%s2816_s6 + $0x28] sm:$0xff] %vm159_vm0, %v1206_v30 }
 0x2ff   :  { %v1208_v51 = vpop.permute.xlu0 %1207 }
 0x300   :  { %1249 = vst.msk [vmem:[%s2816_s6 + $0x30] sm:$0xff] %vm159_vm0, %v1208_v51 }
 0x303   :  { %v1210_v33 = vpop.permute.xlu1 %1209 }
 0x304   :  { %1250 = vst.msk [vmem:[%s2816_s6 + $0x38] sm:$0xff] %vm159_vm0, %v1210_v33 }
 0x307   :  { %v1212_v7 = vpop.permute.xlu0 %1211 }
 0x308   :  { %1251 = vst.msk [vmem:[%s2816_s6 + $0x40] sm:$0xff] %vm159_vm0, %v1212_v7 }
 0x30b   :  { %v1214_v35 = vpop.permute.xlu1 %1213 }
 0x30c   :  { %1252 = vst.msk [vmem:[%s2816_s6 + $0x48] sm:$0xff] %vm159_vm0, %v1214_v35 }
 0x30f   :  { %v1216_v36 = vpop.permute.xlu0 %1215 }
 0x310   :  { %1253 = vst.msk [vmem:[%s2816_s6 + $0x50] sm:$0xff] %vm159_vm0, %v1216_v36 }
 0x313   :  { %v1218_v39 = vpop.permute.xlu1 %1217 }
 0x314   :  { %1254 = vst.msk [vmem:[%s2816_s6 + $0x58] sm:$0xff] %vm159_vm0, %v1218_v39 }
 0x317   :  { %v1220_v57 = vpop.permute.xlu0 %1219 }
 0x318   :  { %1255 = vst.msk [vmem:[%s2816_s6 + $0x60] sm:$0xff] %vm159_vm0, %v1220_v57 }
 0x31b   :  { %v1222_v45 = vpop.permute.xlu1 %1221 }
 0x31c   :  { %1256 = vst.msk [vmem:[%s2816_s6 + $0x68] sm:$0xff] %vm159_vm0, %v1222_v45 }
 0x31e   :  { %v1196_v26 = vpop.permute.xlu0 %1195 }
 0x31f   :  { %1243 = vst.msk [vmem:[%s2816_s6] sm:$0xff] %vm159_vm0, %v1196_v26 }
 0x322   :  { %v1224_v11 = vpop.permute.xlu0 %1223 }
 0x323   :  { %v1226_v22 = vpop.permute.xlu1 %1225  ;;  %1257 = vst.msk [vmem:[%s2816_s6 + $0x70] sm:$0xff] %vm159_vm0, %v1224_v11 }
 0x324   :  { %1258 = vst.msk [vmem:[%s2816_s6 + $0x78] sm:$0xff] %vm159_vm0, %v1226_v22 }
 0x326   :  { %v1304_v1 = vpop.permute.xlu0 %1303 }
 0x327   :  { %v1306_v31 = vpop.permute.xlu1 %1305  ;;  %1337 = vst.msk [vmem:[%s2815_s7 + $0x70] sm:$0xff] %vm159_vm0, %v1304_v1 }
 0x328   :  { %1338 = vst.msk [vmem:[%s2815_s7 + $0x78] sm:$0xff] %vm159_vm0, %v1306_v31 }

// kernel: forward.11
= control target key start
LH: loop header
LB: loop body
LE: loop exit
PB: predicated region body
PF: predicated region fallthrough
CT: control target
= control target key end

     0   :  { %s995_s15 = smov 0   ;;  %s1244_s0 = inlined_call_operand.vmem [shape: f32[2048,50], index: 0, kind: input, shape index: {}]   ;;  %s1245_s1 = inlined_call_operand.vmem [shape: f32[50,2], index: 1, kind: input, shape index: {}]   ;;  %s1246_s2 = inlined_call_operand.vmem [shape: f32[1,2], index: 2, kind: input, shape index: {}]   ;;  %s1247_s3 = inlined_call_operand.vmem [shape: f32[2048,2], index: 3, kind: input, shape index: {}]   ;;  %s1248_s4 = inlined_call_operand.vmem [shape: f32[2048,2], index: 4, kind: output, shape index: {}]  }
   0x1 LB: > { %s792_s16 = sadd.s32 4294967295, %s968_s15   ;;  %p796_p0 = scmp.ge.s32.totalorder %s968_s15, 1  ;;  %s968_s15 = sphi %s995_s15, %s14_s15  }
   0x2   : > { %p174_p1 = scmp.lt.s32.totalorder %s968_s15, 9 }
   0x4   : > { %p175_p2 = pnand %p796_p0, %p174_p1 }
   0x5   : > { %s797_s21 = sshll.u32 (!%p175_p2), %s792_s16, 5 }
   0x6   : > { %178 = sbr.rel (%p175_p2) target bundleno = 258 (0x102), region = 36  ;;  %p206_p3 = scmp.lt.s32.totalorder (!%p175_p2), %s797_s21, 255 }
   0xb   : > { %v261_v0 = vld [vmem:[%s1245_s1 + $0x30] sm:$0x3]  ;;  %vm366_vm0 = vcmask 1041408   ;;  %v260_v1 = vld [vmem:[%s1245_s1 + $0x28] sm:$0xff]  ;;  %v259_v2 = vld [vmem:[%s1245_s1 + $0x20] sm:$0xff]  ;;  %s1250_s21 = smov (!%p206_p3, %s797_s21), 255 }
   0xc   : > { %878 = vmatprep.subr.msk.mxu0 %vm366_vm0, %v261_v0  ;;  %940 = vmatprep.subr.msk.mxu1 %vm366_vm0, %v261_v0  ;;  %v258_v3 = vld [vmem:[%s1245_s1 + $0x18] sm:$0xff]  ;;  %v257_v4 = vld [vmem:[%s1245_s1 + $0x10] sm:$0xff]  ;;  %s1018_s28 = sshll.u32 %s1250_s21, 3  ;;  %v256_v5 = vld [vmem:[%s1245_s1 + $0x8] sm:$0xff]  ;;  %vm269_vm1 = vcmask 408576   ;;  %vm691_vm2 = vcmask 15360  }
   0xd   : > { %879 = vmatpush3.msk.msra.mxu0 %vm366_vm0, %v261_v0  ;;  %947 = vmatpush3.msk.msra.mxu1 %vm366_vm0, %v261_v0  ;;  %s1027_s7 = scalar_lea.vmem %s1244_s0, %s1018_s28  ;;  %v255_v6 = vld [vmem:[%s1245_s1] sm:$0xff]  ;;  %s1105_s14 = scalar_lea.vmem %s1247_s3, %s1018_s28 }
   0xe   : > { %880 = vmatprep.subr.mxu0 %v260_v1  ;;  %941 = vmatprep.subr.mxu1 %v260_v1  ;;  %v223_v7 = vld [vmem:[%s1027_s7] sm:$0xff]  ;;  %v224_v9 = vld [vmem:[%s1027_s7 + $0x8] sm:$0xff]  ;;  %v225_v11 = vld [vmem:[%s1027_s7 + $0x10] sm:$0xff]  ;;  %s1117_s18 = scalar_lea.vmem %s1248_s4, %s1018_s28 }
   0xf   : > { %881 = vmatpush3.msra.mxu0 %v260_v1  ;;  %948 = vmatpush3.msra.mxu1 %v260_v1  ;;  %v239_v8 = vld [vmem:[%s1027_s7 + $0x80] sm:$0xff]  ;;  %v240_v10 = vld [vmem:[%s1027_s7 + $0x88] sm:$0xff]  ;;  %v241_v12 = vld [vmem:[%s1027_s7 + $0x90] sm:$0xff] }
  0x10   : > { %882 = vmatprep.subr.mxu0 %v259_v2  ;;  %942 = vmatprep.subr.mxu1 %v259_v2  ;;  %v226_v13 = vld [vmem:[%s1027_s7 + $0x18] sm:$0xff]  ;;  %v227_v15 = vld [vmem:[%s1027_s7 + $0x20] sm:$0xff]  ;;  %v228_v17 = vld [vmem:[%s1027_s7 + $0x28] sm:$0xff] }
  0x11   : > { %883 = vmatpush3.msra.mxu0 %v259_v2  ;;  %949 = vmatpush3.msra.mxu1 %v259_v2  ;;  %v242_v14 = vld [vmem:[%s1027_s7 + $0x98] sm:$0xff]  ;;  %v243_v16 = vld [vmem:[%s1027_s7 + $0xa0] sm:$0xff]  ;;  %v244_v18 = vld [vmem:[%s1027_s7 + $0xa8] sm:$0xff] }
  0x12   : > { %884 = vmatprep.subr.mxu0 %v258_v3  ;;  %943 = vmatprep.subr.mxu1 %v258_v3  ;;  %v229_v19 = vld [vmem:[%s1027_s7 + $0x30] sm:$0xff]  ;;  %v230_v21 = vld [vmem:[%s1027_s7 + $0x38] sm:$0xff]  ;;  %v231_v23 = vld [vmem:[%s1027_s7 + $0x40] sm:$0xff] }
  0x13   : > { %885 = vmatpush3.msra.mxu0 %v258_v3  ;;  %950 = vmatpush3.msra.mxu1 %v258_v3  ;;  %v245_v20 = vld [vmem:[%s1027_s7 + $0xb0] sm:$0xff]  ;;  %v246_v22 = vld [vmem:[%s1027_s7 + $0xb8] sm:$0xff]  ;;  %v247_v24 = vld [vmem:[%s1027_s7 + $0xc0] sm:$0xff] }
  0x14   : > { %886 = vmatprep.subr.mxu0 %v257_v4  ;;  %944 = vmatprep.subr.mxu1 %v257_v4  ;;  %v232_v25 = vld [vmem:[%s1027_s7 + $0x48] sm:$0xff]  ;;  %v233_v27 = vld [vmem:[%s1027_s7 + $0x50] sm:$0xff]  ;;  %v234_v29 = vld [vmem:[%s1027_s7 + $0x58] sm:$0xff] }
  0x15   : > { %887 = vmatpush3.msra.mxu0 %v257_v4  ;;  %951 = vmatpush3.msra.mxu1 %v257_v4  ;;  %v248_v26 = vld [vmem:[%s1027_s7 + $0xc8] sm:$0xff]  ;;  %v249_v28 = vld [vmem:[%s1027_s7 + $0xd0] sm:$0xff]  ;;  %v250_v30 = vld [vmem:[%s1027_s7 + $0xd8] sm:$0xff] }
  0x16   : > { %888 = vmatprep.subr.mxu0 %v256_v5  ;;  %945 = vmatprep.subr.mxu1 %v256_v5  ;;  %v235_v31 = vld [vmem:[%s1027_s7 + $0x60] sm:$0xff]  ;;  %v236_v33 = vld [vmem:[%s1027_s7 + $0x68] sm:$0xff]  ;;  %v237_v35 = vld [vmem:[%s1027_s7 + $0x70] sm:$0xff] }
  0x17   : > { %889 = vmatpush3.msra.mxu0 %v256_v5  ;;  %952 = vmatpush3.msra.mxu1 %v256_v5  ;;  %v251_v32 = vld [vmem:[%s1027_s7 + $0xe0] sm:$0xff]  ;;  %v252_v34 = vld [vmem:[%s1027_s7 + $0xe8] sm:$0xff]  ;;  %v253_v36 = vld [vmem:[%s1027_s7 + $0xf0] sm:$0xff] }
  0x18   : > { %890 = vmatprep.subr.mxu0 %v255_v6  ;;  %946 = vmatprep.subr.mxu1 %v255_v6  ;;  %v238_v37 = vld [vmem:[%s1027_s7 + $0x78] sm:$0xff]  ;;  %v1099_v39 = vld [vmem:[%s1246_s2] ss:$0 sm:$0xff]  ;;  %v596_v44 = vld [vmem:[%s1105_s14 + $0x8] sm:$0xff] }
  0x19   : > { %891 = vmatpush3.msra.mxu0 %v255_v6  ;;  %953 = vmatpush3.msra.mxu1 %v255_v6  ;;  %v254_v38 = vld [vmem:[%s1027_s7 + $0xf8] sm:$0xff]  ;;  %v612_v45 = vld [vmem:[%s1105_s14 + $0x88] sm:$0xff]  ;;  %v595_v52 = vld [vmem:[%s1105_s14] sm:$0xff] }
  0x1a   : > { %892 = vmatprep.mubr.msk.f32.mxu0 %vm269_vm1, %v223_v7  ;;  %916 = vmatprep.mubr.msk.f32.mxu1 %vm269_vm1, %v239_v8  ;;  %v611_v53 = vld [vmem:[%s1105_s14 + $0x80] sm:$0xff]  ;;  %v598_v2 = vld [vmem:[%s1105_s14 + $0x18] sm:$0xff]  ;;  %v597_v8 = vld [vmem:[%s1105_s14 + $0x10] sm:$0xff] }
  0x1b   : > { %893 = vmatmul.mubr.msk.f32.vlgmr.msra.gmra.mxu0 %vm269_vm1, %v224_v9  ;;  %917 = vmatmul.mubr.msk.f32.vlgmr.msra.gmra.mxu1 %vm269_vm1, %v240_v10  ;;  %v614_v3 = vld [vmem:[%s1105_s14 + $0x98] sm:$0xff]  ;;  %v613_v9 = vld [vmem:[%s1105_s14 + $0x90] sm:$0xff] }
  0x1c   : > { %895 = vmatprep.mubr.msk.f32.mxu0 %vm269_vm1, %v225_v11  ;;  %919 = vmatprep.mubr.msk.f32.mxu1 %vm269_vm1, %v241_v12 }
  0x1f   : > { %896 = vmatmul.mubr.msk.f32.gmra.mxu0 %vm269_vm1, %v226_v13  ;;  %920 = vmatmul.mubr.msk.f32.gmra.mxu1 %vm269_vm1, %v242_v14 }
  0x20   : > { %898 = vmatprep.mubr.msk.f32.mxu0 %vm269_vm1, %v227_v15  ;;  %922 = vmatprep.mubr.msk.f32.mxu1 %vm269_vm1, %v243_v16 }
  0x23   : > { %899 = vmatmul.mubr.msk.f32.gmra.mxu0 %vm269_vm1, %v228_v17  ;;  %923 = vmatmul.mubr.msk.f32.gmra.mxu1 %vm269_vm1, %v244_v18  ;;  %v600_v18 = vld [vmem:[%s1105_s14 + $0x28] sm:$0xff] }
  0x24   : > { %901 = vmatprep.mubr.msk.f32.mxu0 %vm269_vm1, %v229_v19  ;;  %925 = vmatprep.mubr.msk.f32.mxu1 %vm269_vm1, %v245_v20  ;;  %v616_v19 = vld [vmem:[%s1105_s14 + $0xa8] sm:$0xff] }
  0x27   : > { %902 = vmatmul.mubr.msk.f32.gmra.mxu0 %vm269_vm1, %v230_v21  ;;  %926 = vmatmul.mubr.msk.f32.gmra.mxu1 %vm269_vm1, %v246_v22 }
  0x28   : > { %904 = vmatprep.mubr.msk.f32.mxu0 %vm269_vm1, %v231_v23  ;;  %928 = vmatprep.mubr.msk.f32.mxu1 %vm269_vm1, %v247_v24 }
  0x2b   : > { %905 = vmatmul.mubr.msk.f32.gmra.mxu0 %vm269_vm1, %v232_v25  ;;  %929 = vmatmul.mubr.msk.f32.gmra.mxu1 %vm269_vm1, %v248_v26 }
  0x2c   : > { %907 = vmatprep.mubr.msk.f32.mxu0 %vm269_vm1, %v233_v27  ;;  %931 = vmatprep.mubr.msk.f32.mxu1 %vm269_vm1, %v249_v28 }
  0x2f   : > { %908 = vmatmul.mubr.msk.f32.gmra.mxu0 %vm269_vm1, %v234_v29  ;;  %932 = vmatmul.mubr.msk.f32.gmra.mxu1 %vm269_vm1, %v250_v30 }
  0x30   : > { %910 = vmatprep.mubr.msk.f32.mxu0 %vm269_vm1, %v235_v31  ;;  %934 = vmatprep.mubr.msk.f32.mxu1 %vm269_vm1, %v251_v32  ;;  %v599_v32 = vld [vmem:[%s1105_s14 + $0x20] sm:$0xff] }
  0x33   : > { %911 = vmatmul.mubr.msk.f32.gmra.mxu0 %vm269_vm1, %v236_v33  ;;  %935 = vmatmul.mubr.msk.f32.gmra.mxu1 %vm269_vm1, %v252_v34  ;;  %v615_v33 = vld [vmem:[%s1105_s14 + $0xa0] sm:$0xff] }
  0x34   : > { %913 = vmatprep.mubr.msk.f32.mxu0 %vm269_vm1, %v237_v35  ;;  %937 = vmatprep.mubr.msk.f32.mxu1 %vm269_vm1, %v253_v36 }
  0x37   : > { %914 = vmatmul.mubr.msk.f32.gmra.mxu0 %vm269_vm1, %v238_v37  ;;  %938 = vmatmul.mubr.msk.f32.gmra.mxu1 %vm269_vm1, %v254_v38  ;;  %v602_v38 = vld [vmem:[%s1105_s14 + $0x38] sm:$0xff] }
  0xdb   : > { %v894_v40 = vpop.f32.mrf.mxu0  ;;  %v918_v41 = vpop.f32.mrf.mxu1 }
  0xdc   : > { %v442_v42 = vadd.f32 %v894_v40, %v1099_v39  ;;  %v522_v43 = vadd.f32 %v918_v41, %v1099_v39  ;;  %v618_v40 = vld [vmem:[%s1105_s14 + $0xb8] sm:$0xff] }
  0xdd   : > { %v436_v46 = vpop.f32.mrf.mxu0  ;;  %v516_v47 = vpop.f32.mrf.mxu1 }
  0xde   : > { %v628_v48 = vmul.f32 0.002, %v442_v42  ;;  %v644_v49 = vmul.f32 0.002, %v522_v43  ;;  %v437_v50 = vadd.f32 %v1099_v39, %v436_v46  ;;  %v517_v51 = vadd.f32 %v1099_v39, %v516_v47 }
  0xdf   : > { %v897_v54 = vpop.f32.mrf.mxu0  ;;  %v921_v55 = vpop.f32.mrf.mxu1 }
  0xe0   : > { %v660_v56 = vadd.f32 %v628_v48, %v596_v44  ;;  %v676_v57 = vadd.f32 %v644_v49, %v612_v45  ;;  %v627_v58 = vmul.f32 0.002, %v437_v50  ;;  %v643_v59 = vmul.f32 0.002, %v517_v51  ;;  %v601_v49 = vld [vmem:[%s1105_s14 + $0x30] sm:$0xff] }
  0xe1   : > { %v452_v60 = vadd.f32 %v897_v54, %v1099_v39  ;;  %v532_v61 = vadd.f32 %v921_v55, %v1099_v39  ;;  %v446_v62 = vpop.f32.mrf.mxu0  ;;  %v526_v63 = vpop.f32.mrf.mxu1  ;;  %v617_v50 = vld [vmem:[%s1105_s14 + $0xb0] sm:$0xff] }
  0xe2   : > { %693 = vst.msk [vmem:[%s1117_s18 + $0x8] sm:$0xff] %vm691_vm2, %v660_v56  ;;  %709 = vst.msk [vmem:[%s1117_s18 + $0x88] sm:$0xff] %vm691_vm2, %v676_v57  ;;  %v659_v0 = vadd.f32 %v627_v58, %v595_v52  ;;  %v675_v1 = vadd.f32 %v643_v59, %v611_v53  ;;  %v447_v4 = vadd.f32 %v1099_v39, %v446_v62 }
  0xe3   : > { %v527_v5 = vadd.f32 %v1099_v39, %v526_v63  ;;  %v630_v6 = vmul.f32 0.002, %v452_v60  ;;  %v646_v7 = vmul.f32 0.002, %v532_v61  ;;  %v900_v10 = vpop.f32.mrf.mxu0  ;;  %v924_v11 = vpop.f32.mrf.mxu1  ;;  %v604_v63 = vld [vmem:[%s1105_s14 + $0x48] sm:$0xff] }
  0xe4   : > { %692 = vst.msk [vmem:[%s1117_s18] sm:$0xff] %vm691_vm2, %v659_v0  ;;  %708 = vst.msk [vmem:[%s1117_s18 + $0x80] sm:$0xff] %vm691_vm2, %v675_v1  ;;  %v629_v12 = vmul.f32 0.002, %v447_v4  ;;  %v462_v14 = vadd.f32 %v900_v10, %v1099_v39  ;;  %v542_v15 = vadd.f32 %v924_v11, %v1099_v39  ;;  %v620_v0 = vld [vmem:[%s1105_s14 + $0xc8] sm:$0xff] }
  0xe5   : > { %v645_v13 = vmul.f32 0.002, %v527_v5  ;;  %v662_v16 = vadd.f32 %v630_v6, %v598_v2  ;;  %v678_v17 = vadd.f32 %v646_v7, %v614_v3  ;;  %v456_v20 = vpop.f32.mrf.mxu0  ;;  %v536_v21 = vpop.f32.mrf.mxu1  ;;  %v603_v5 = vld [vmem:[%s1105_s14 + $0x40] sm:$0xff] }
  0xe6   : > { %v661_v22 = vadd.f32 %v629_v12, %v597_v8  ;;  %v632_v24 = vmul.f32 0.002, %v462_v14  ;;  %v648_v25 = vmul.f32 0.002, %v542_v15  ;;  %v457_v26 = vadd.f32 %v1099_v39, %v456_v20  ;;  %v619_v6 = vld [vmem:[%s1105_s14 + $0xc0] sm:$0xff]  ;;  %v606_v15 = vld [vmem:[%s1105_s14 + $0x58] sm:$0xff] }
  0xe7   : > { %v677_v23 = vadd.f32 %v645_v13, %v613_v9  ;;  %695 = vst.msk [vmem:[%s1117_s18 + $0x18] sm:$0xff] %vm691_vm2, %v662_v16  ;;  %711 = vst.msk [vmem:[%s1117_s18 + $0x98] sm:$0xff] %vm691_vm2, %v678_v17  ;;  %v537_v27 = vadd.f32 %v1099_v39, %v536_v21  ;;  %v903_v28 = vpop.f32.mrf.mxu0  ;;  %v927_v29 = vpop.f32.mrf.mxu1  ;;  %v622_v16 = vld [vmem:[%s1105_s14 + $0xd8] sm:$0xff] }
  0xe8   : > { %694 = vst.msk [vmem:[%s1117_s18 + $0x10] sm:$0xff] %vm691_vm2, %v661_v22  ;;  %v664_v30 = vadd.f32 %v632_v24, %v600_v18  ;;  %v680_v31 = vadd.f32 %v648_v25, %v616_v19  ;;  %v472_v34 = vadd.f32 %v903_v28, %v1099_v39  ;;  %v552_v35 = vadd.f32 %v927_v29, %v1099_v39  ;;  %v605_v29 = vld [vmem:[%s1105_s14 + $0x50] sm:$0xff] }
  0xe9   : > { %710 = vst.msk [vmem:[%s1117_s18 + $0x90] sm:$0xff] %vm691_vm2, %v677_v23  ;;  %v631_v36 = vmul.f32 0.002, %v457_v26  ;;  %v647_v37 = vmul.f32 0.002, %v537_v27  ;;  %v466_v41 = vpop.f32.mrf.mxu0  ;;  %v546_v42 = vpop.f32.mrf.mxu1 }
  0xea   : > { %697 = vst.msk [vmem:[%s1117_s18 + $0x28] sm:$0xff] %vm691_vm2, %v664_v30  ;;  %713 = vst.msk [vmem:[%s1117_s18 + $0xa8] sm:$0xff] %vm691_vm2, %v680_v31  ;;  %v634_v43 = vmul.f32 0.002, %v472_v34  ;;  %v650_v44 = vmul.f32 0.002, %v552_v35  ;;  %v467_v45 = vadd.f32 %v1099_v39, %v466_v41  ;;  %v547_v46 = vadd.f32 %v1099_v39, %v546_v42 }
  0xeb   : > { %v663_v47 = vadd.f32 %v631_v36, %v599_v32  ;;  %v679_v48 = vadd.f32 %v647_v37, %v615_v33  ;;  %v906_v51 = vpop.f32.mrf.mxu0  ;;  %v930_v52 = vpop.f32.mrf.mxu1  ;;  %v621_v30 = vld [vmem:[%s1105_s14 + $0xd0] sm:$0xff]  ;;  %v608_v35 = vld [vmem:[%s1105_s14 + $0x68] sm:$0xff] }
  0xec   : > { %v666_v53 = vadd.f32 %v634_v43, %v602_v38  ;;  %v682_v54 = vadd.f32 %v650_v44, %v618_v40  ;;  %v633_v55 = vmul.f32 0.002, %v467_v45  ;;  %v649_v56 = vmul.f32 0.002, %v547_v46  ;;  %v624_v36 = vld [vmem:[%s1105_s14 + $0xe8] sm:$0xff]  ;;  %v607_v46 = vld [vmem:[%s1105_s14 + $0x60] sm:$0xff] }
  0xed   : > { %696 = vst.msk [vmem:[%s1117_s18 + $0x20] sm:$0xff] %vm691_vm2, %v663_v47  ;;  %712 = vst.msk [vmem:[%s1117_s18 + $0xa0] sm:$0xff] %vm691_vm2, %v679_v48  ;;  %v482_v57 = vadd.f32 %v906_v51, %v1099_v39  ;;  %v562_v58 = vadd.f32 %v930_v52, %v1099_v39  ;;  %v476_v59 = vpop.f32.mrf.mxu0  ;;  %v556_v60 = vpop.f32.mrf.mxu1  ;;  %v623_v47 = vld [vmem:[%s1105_s14 + $0xe0] sm:$0xff] }
  0xee   : > { %699 = vst.msk [vmem:[%s1117_s18 + $0x38] sm:$0xff] %vm691_vm2, %v666_v53  ;;  %715 = vst.msk [vmem:[%s1117_s18 + $0xb8] sm:$0xff] %vm691_vm2, %v682_v54  ;;  %v665_v61 = vadd.f32 %v633_v55, %v601_v49  ;;  %v681_v62 = vadd.f32 %v649_v56, %v617_v50  ;;  %v477_v1 = vadd.f32 %v1099_v39, %v476_v59 }
  0xef   : > { %v557_v2 = vadd.f32 %v1099_v39, %v556_v60  ;;  %v636_v3 = vmul.f32 0.002, %v482_v57  ;;  %v652_v4 = vmul.f32 0.002, %v562_v58  ;;  %v909_v7 = vpop.f32.mrf.mxu0  ;;  %v933_v8 = vpop.f32.mrf.mxu1  ;;  %v610_v60 = vld [vmem:[%s1105_s14 + $0x78] sm:$0xff] }
  0xf0   : > { %698 = vst.msk [vmem:[%s1117_s18 + $0x30] sm:$0xff] %vm691_vm2, %v665_v61  ;;  %714 = vst.msk [vmem:[%s1117_s18 + $0xb0] sm:$0xff] %vm691_vm2, %v681_v62  ;;  %v635_v9 = vmul.f32 0.002, %v477_v1  ;;  %v492_v11 = vadd.f32 %v909_v7, %v1099_v39  ;;  %v572_v12 = vadd.f32 %v933_v8, %v1099_v39  ;;  %v626_v61 = vld [vmem:[%s1105_s14 + $0xf8] sm:$0xff] }
  0xf1   : > { %v651_v10 = vmul.f32 0.002, %v557_v2  ;;  %v668_v13 = vadd.f32 %v636_v3, %v604_v63  ;;  %v684_v14 = vadd.f32 %v652_v4, %v620_v0  ;;  %v486_v17 = vpop.f32.mrf.mxu0  ;;  %v566_v18 = vpop.f32.mrf.mxu1  ;;  %v609_v2 = vld [vmem:[%s1105_s14 + $0x70] sm:$0xff] }
  0xf2   : > { %v667_v19 = vadd.f32 %v635_v9, %v603_v5  ;;  %v638_v21 = vmul.f32 0.002, %v492_v11  ;;  %v654_v22 = vmul.f32 0.002, %v572_v12  ;;  %v487_v23 = vadd.f32 %v1099_v39, %v486_v17  ;;  %v625_v3 = vld [vmem:[%s1105_s14 + $0xf0] sm:$0xff] }
  0xf3   : > { %v683_v20 = vadd.f32 %v651_v10, %v619_v6  ;;  %701 = vst.msk [vmem:[%s1117_s18 + $0x48] sm:$0xff] %vm691_vm2, %v668_v13  ;;  %717 = vst.msk [vmem:[%s1117_s18 + $0xc8] sm:$0xff] %vm691_vm2, %v684_v14  ;;  %v567_v24 = vadd.f32 %v1099_v39, %v566_v18  ;;  %v912_v25 = vpop.f32.mrf.mxu0  ;;  %v936_v26 = vpop.f32.mrf.mxu1 }
  0xf4   : > { %700 = vst.msk [vmem:[%s1117_s18 + $0x40] sm:$0xff] %vm691_vm2, %v667_v19  ;;  %v670_v27 = vadd.f32 %v638_v21, %v606_v15  ;;  %v686_v28 = vadd.f32 %v654_v22, %v622_v16  ;;  %v502_v31 = vadd.f32 %v912_v25, %v1099_v39  ;;  %v582_v32 = vadd.f32 %v936_v26, %v1099_v39 }
  0xf5   : > { %716 = vst.msk [vmem:[%s1117_s18 + $0xc0] sm:$0xff] %vm691_vm2, %v683_v20  ;;  %v637_v33 = vmul.f32 0.002, %v487_v23  ;;  %v653_v34 = vmul.f32 0.002, %v567_v24  ;;  %v496_v37 = vpop.f32.mrf.mxu0  ;;  %v576_v38 = vpop.f32.mrf.mxu1 }
  0xf6   : > { %703 = vst.msk [vmem:[%s1117_s18 + $0x58] sm:$0xff] %vm691_vm2, %v670_v27  ;;  %719 = vst.msk [vmem:[%s1117_s18 + $0xd8] sm:$0xff] %vm691_vm2, %v686_v28  ;;  %v640_v40 = vmul.f32 0.002, %v502_v31  ;;  %v656_v41 = vmul.f32 0.002, %v582_v32  ;;  %v497_v42 = vadd.f32 %v1099_v39, %v496_v37  ;;  %v577_v43 = vadd.f32 %v1099_v39, %v576_v38 }
  0xf7   : > { %v669_v44 = vadd.f32 %v637_v33, %v605_v29  ;;  %v685_v45 = vadd.f32 %v653_v34, %v621_v30  ;;  %v915_v48 = vpop.f32.mrf.mxu0  ;;  %v939_v49 = vpop.f32.mrf.mxu1 }
  0xf8   : > { %v672_v50 = vadd.f32 %v640_v40, %v608_v35  ;;  %v688_v51 = vadd.f32 %v656_v41, %v624_v36  ;;  %v639_v52 = vmul.f32 0.002, %v497_v42  ;;  %v655_v53 = vmul.f32 0.002, %v577_v43 }
  0xf9   : > { %702 = vst.msk [vmem:[%s1117_s18 + $0x50] sm:$0xff] %vm691_vm2, %v669_v44  ;;  %718 = vst.msk [vmem:[%s1117_s18 + $0xd0] sm:$0xff] %vm691_vm2, %v685_v45  ;;  %v512_v54 = vadd.f32 %v915_v48, %v1099_v39  ;;  %v592_v55 = vadd.f32 %v939_v49, %v1099_v39  ;;  %v506_v56 = vpop.f32.mrf.mxu0  ;;  %v586_v57 = vpop.f32.mrf.mxu1 }
  0xfa   : > { %705 = vst.msk [vmem:[%s1117_s18 + $0x68] sm:$0xff] %vm691_vm2, %v672_v50  ;;  %721 = vst.msk [vmem:[%s1117_s18 + $0xe8] sm:$0xff] %vm691_vm2, %v688_v51  ;;  %v671_v58 = vadd.f32 %v639_v52, %v607_v46  ;;  %v687_v59 = vadd.f32 %v655_v53, %v623_v47  ;;  %v507_v62 = vadd.f32 %v1099_v39, %v506_v56 }
  0xfb   : > { %v587_v63 = vadd.f32 %v1099_v39, %v586_v57  ;;  %v642_v0 = vmul.f32 0.002, %v512_v54  ;;  %v658_v1 = vmul.f32 0.002, %v592_v55 }
  0xfc   : > { %704 = vst.msk [vmem:[%s1117_s18 + $0x60] sm:$0xff] %vm691_vm2, %v671_v58  ;;  %720 = vst.msk [vmem:[%s1117_s18 + $0xe0] sm:$0xff] %vm691_vm2, %v687_v59  ;;  %v641_v4 = vmul.f32 0.002, %v507_v62 }
  0xfd   : > { %v657_v5 = vmul.f32 0.002, %v587_v63  ;;  %v674_v6 = vadd.f32 %v642_v0, %v610_v60  ;;  %v690_v7 = vadd.f32 %v658_v1, %v626_v61 }
  0xfe   : > { %v673_v8 = vadd.f32 %v641_v4, %v609_v2 }
  0xff   : > { %v689_v9 = vadd.f32 %v657_v5, %v625_v3  ;;  %707 = vst.msk [vmem:[%s1117_s18 + $0x78] sm:$0xff] %vm691_vm2, %v674_v6  ;;  %723 = vst.msk [vmem:[%s1117_s18 + $0xf8] sm:$0xff] %vm691_vm2, %v690_v7 }
 0x100   : > { %706 = vst.msk [vmem:[%s1117_s18 + $0x70] sm:$0xff] %vm691_vm2, %v673_v8 }
 0x101   : > { %722 = vst.msk [vmem:[%s1117_s18 + $0xf0] sm:$0xff] %vm691_vm2, %v689_v9 }
 0x102 PF: > { %s14_s15 = sadd.s32 1, %s968_s15  }
 0x103   : > { %p11_p4 = scmp.ge.s32.totalorder %s14_s15, 10  }
 0x105   :  { %13 = sbr.rel (!%p11_p4) target bundleno = 1 (0x1), region = 69 }

</bundles_post_ra>
